<compile_context>
chip_gen: v6e
topology: v6e:2x2x1
jax: 0.10.0
libtpu: 0.0.40
codegen_flags: <defaults>
</compile_context>

<pallas_src>
import functools

import jax
import jax.numpy as jnp
from jax.experimental import pallas as pl
from jax.experimental.pallas import tpu as pltpu


# ----------------------------------------------------------------------------
# small helpers (wrapper side)
# ----------------------------------------------------------------------------
def _pick_tile(n, cap=8):
    """Largest divisor of n that is <= cap (row-slab height)."""
    t = min(n, cap)
    while n % t:
        t -= 1
    return t


def _s1_weight(w_oihw):
    """[Cout, Cin, 3, 3] -> [3 (dy), 3*Cin (dx-major), Cout], bf16."""
    cout, cin, _, _ = w_oihw.shape
    return jnp.transpose(w_oihw, (2, 3, 1, 0)).reshape(3, 3 * cin, cout).astype(jnp.bfloat16)


def _s2_weight(w_oihw):
    """[Cout, Cin, 3, 3] -> [9*Cin ((dy,dx)-major), Cout], bf16."""
    cout, cin, _, _ = w_oihw.shape
    return jnp.transpose(w_oihw, (2, 3, 1, 0)).reshape(9 * cin, cout).astype(jnp.bfloat16)


def _dx_stack_slabs(x_nhwc, tr):
    """Zero-pad (H, W) by 1, fold the 3 dx taps into channels and cut H into
    overlapping (tr+2)-row slabs.  Returns bf16 [B*nH, tr+2, W, 3*C]."""
    b, h, w, c = x_nhwc.shape
    xp = jnp.pad(x_nhwc, ((0, 0), (1, 1), (1, 1), (0, 0)))
    xs = jnp.concatenate(
        [xp[:, :, 0:w, :], xp[:, :, 1:w + 1, :], xp[:, :, 2:w + 2, :]], axis=-1)
    nh = h // tr
    slabs = jnp.stack([xs[:, r * tr:r * tr + tr + 2] for r in range(nh)], axis=1)
    return slabs.reshape(b * nh, tr + 2, w, 3 * c).astype(jnp.bfloat16)


def _s2_im2col(x_nhwc, hout, wout):
    """Full stride-2 3x3 im2col:  out[b,oy,ox,(dy*3+dx)*C+c] = pad(x)[b,2oy+dy,2ox+dx,c].
    Returns bf16 [B, Hout, Wout, 9*C]."""
    xp = jnp.pad(x_nhwc, ((0, 0), (1, 1), (1, 1), (0, 0)))
    cols = []
    for dy in range(3):
        for dx in range(3):
            cols.append(xp[:, dy:dy + 2 * hout - 1:2, dx:dx + 2 * wout - 1:2, :])
    return jnp.concatenate(cols, axis=-1).astype(jnp.bfloat16)


# ----------------------------------------------------------------------------
# Kernel 1: 3x3 / stride-1 conv + bias + SiLU  (+ optional GroupNorm stats)
# ----------------------------------------------------------------------------
def _conv_s1_kernel(xs_ref, w_ref, b_ref, o_ref, *stats_refs, tr, with_stats):
    # xs_ref : [1, tr+2, W, 3*Cin]  bf16 (dx folded into K, dy via row halo)
    # w_ref  : [3, 3*Cin, Cout]     bf16
    # b_ref  : [1, Cout]            fp32
    # o_ref  : [1, tr, W, Cout]
    # stats  : [1, 2, Cout]         fp32, revisited across the row axis
    _, _, wdim, k3 = xs_ref.shape
    cout = o_ref.shape[-1]

    xs = xs_ref[0]                                        # [tr+2, W, 3*Cin]
    acc = jnp.zeros((tr * wdim, cout), jnp.float32)
    for dy in range(3):                                   # dy: leading-axis slice
        patch = xs[dy:dy + tr].reshape(tr * wdim, k3)     # no sublane relayout
        acc = acc + jnp.dot(patch, w_ref[dy],
                            preferred_element_type=jnp.float32)
    acc = acc + b_ref[...]
    y = acc * jax.nn.sigmoid(acc)                         # SiLU in fp32
    o_ref[0] = y.reshape(tr, wdim, cout).astype(o_ref.dtype)

    if with_stats:
        stats_ref = stats_refs[0]

        @pl.when(pl.program_id(1) == 0)
        def _():
            stats_ref[...] = jnp.zeros_like(stats_ref)

        # Per-channel sum / sum-of-squares of the fp32 activations; the tiny
        # channel->group reduction is finished in the wrapper.
        srow = jnp.concatenate(
            [jnp.sum(y, axis=0, keepdims=True),
             jnp.sum(y * y, axis=0, keepdims=True)], axis=0)      # [2, Cout]
        stats_ref[0] += srow


def conv3x3_s1(xs_slabs, w, b, *, h, out_dtype, with_stats):
    bn, trp2, wdim, k3 = xs_slabs.shape
    tr = trp2 - 2
    nh = h // tr
    bsz = bn // nh
    cout = w.shape[-1]
    kern = functools.partial(_conv_s1_kernel, tr=tr, with_stats=with_stats)

    in_specs = [
        pl.BlockSpec((1, trp2, wdim, k3), lambda bi, ri: (bi * nh + ri, 0, 0, 0)),
        pl.BlockSpec((3, k3, cout), lambda bi, ri: (0, 0, 0)),
        pl.BlockSpec((1, cout), lambda bi, ri: (0, 0)),
    ]
    out_spec_y = pl.BlockSpec((1, tr, wdim, cout), lambda bi, ri: (bi, ri, 0, 0))
    if with_stats:
        out_shape = (jax.ShapeDtypeStruct((bsz, h, wdim, cout), out_dtype),
                     jax.ShapeDtypeStruct((bsz, 2, cout), jnp.float32))
        out_specs = (out_spec_y,
                     pl.BlockSpec((1, 2, cout), lambda bi, ri: (bi, 0, 0)))
        dims = ("parallel", "arbitrary")          # stats block revisited over ri
    else:
        out_shape = jax.ShapeDtypeStruct((bsz, h, wdim, cout), out_dtype)
        out_specs = out_spec_y
        dims = ("parallel", "parallel")

    return pl.pallas_call(
        kern,
        out_shape=out_shape,
        grid=(bsz, nh),
        in_specs=in_specs,
        out_specs=out_specs,
        compiler_params=pltpu.CompilerParams(dimension_semantics=dims),
    )(xs_slabs, w, b)


# ----------------------------------------------------------------------------
# Kernel 2: 3x3 / stride-2 conv (full im2col input) + bias + SiLU
# ----------------------------------------------------------------------------
def _conv_s2_kernel(xc_ref, w_ref, b_ref, o_ref):
    # xc_ref: [1, tro, Wout, 9*C] bf16 ; w_ref: [9*C, C] bf16 ; b_ref: [1, C] fp32
    _, tro, wout, k9 = xc_ref.shape
    cout = o_ref.shape[-1]
    xc = xc_ref[0].reshape(tro * wout, k9)
    acc = jnp.dot(xc, w_ref[...], preferred_element_type=jnp.float32) + b_ref[...]
    y = acc * jax.nn.sigmoid(acc)                         # SiLU
    o_ref[0] = y.reshape(tro, wout, cout).astype(o_ref.dtype)


def conv3x3_s2(xcol, w, b):
    bsz, hout, wout, k9 = xcol.shape
    cout = w.shape[-1]
    tro = _pick_tile(hout, 8)
    nho = hout // tro
    return pl.pallas_call(
        _conv_s2_kernel,
        out_shape=jax.ShapeDtypeStruct((bsz, hout, wout, cout), jnp.float32),
        grid=(bsz, nho),
        in_specs=[
            pl.BlockSpec((1, tro, wout, k9), lambda bi, ri: (bi, ri, 0, 0)),
            pl.BlockSpec((k9, cout), lambda bi, ri: (0, 0)),
            pl.BlockSpec((1, cout), lambda bi, ri: (0, 0)),
        ],
        out_specs=pl.BlockSpec((1, tro, wout, cout), lambda bi, ri: (bi, ri, 0, 0)),
        compiler_params=pltpu.CompilerParams(
            dimension_semantics=("parallel", "parallel")),
    )(xcol, w, b)


# ----------------------------------------------------------------------------
# Full forward pass (glue in plain JAX, hot paths in Pallas)
# ----------------------------------------------------------------------------
def downsampling_block_2d(params, x, *, num_groups=32, eps=1e-5):
    """x: [B, Cin, H, W] (NCHW). Returns (out [B,C,H/2,W/2], x_skip [B,C,H,W])."""
    bsz, cin, h, w = x.shape
    cout = params["w1"].shape[0]
    assert cout % num_groups == 0
    tr = _pick_tile(h, 8)

    w1k, w2k, w3k = _s1_weight(params["w1"]), _s1_weight(params["w2"]), _s2_weight(params["w3"])
    b1 = params["b1"].reshape(1, cout).astype(jnp.float32)
    b2 = params["b2"].reshape(1, cout).astype(jnp.float32)
    b3 = params["b3"].reshape(1, cout).astype(jnp.float32)

    x_nhwc = jnp.transpose(x, (0, 2, 3, 1)).astype(jnp.float32)

    # ---- conv1 + SiLU, fused with GroupNorm sum / sumsq accumulation ----
    xs1 = _dx_stack_slabs(x_nhwc, tr)
    a, stats = conv3x3_s1(xs1, w1k, b1, h=h, out_dtype=jnp.bfloat16, with_stats=True)

    # ---- conv2 + SiLU  ->  x_skip ----
    xs2 = _dx_stack_slabs(a, tr)
    x_skip = conv3x3_s1(xs2, w2k, b2, h=h, out_dtype=jnp.float32, with_stats=False)

    # ---- GroupNorm(32, C): finish the tiny group reduction, fold normalize +
    #      affine into a per-(batch, channel) scale/shift ----
    g = num_groups
    cg = cout // g
    n_elem = float(h * w * cg)
    sum_g = stats[:, 0].reshape(bsz, g, cg).sum(-1)
    sq_g = stats[:, 1].reshape(bsz, g, cg).sum(-1)
    mean_g = sum_g / n_elem
    var_g = sq_g / n_elem - mean_g * mean_g      # fp32; post-SiLU values are O(1)
    rstd_g = jax.lax.rsqrt(var_g + eps)
    gamma = params["gamma"].reshape(g, cg)
    beta = params["beta"].reshape(g, cg)
    scale_c = (gamma[None] * rstd_g[:, :, None]).reshape(bsz, cout)
    shift_c = (beta[None] - gamma[None] * mean_g[:, :, None] * rstd_g[:, :, None]).reshape(bsz, cout)

    # ---- conv3 (stride 2) + SiLU: GN normalize applied to `a` inside the XLA
    #      producer of the strided im2col input (no standalone GN HBM pass) ----
    a_norm = a.astype(jnp.float32) * scale_c[:, None, None, :] + shift_c[:, None, None, :]
    hout = (h - 1) // 2 + 1
    wout = (w - 1) // 2 + 1
    xcol3 = _s2_im2col(a_norm, hout, wout)
    out = conv3x3_s2(xcol3, w3k, b3)

    return (jnp.transpose(out, (0, 3, 1, 2)),
            jnp.transpose(x_skip, (0, 3, 1, 2)))


# ----------------------------------------------------------------------------
# Pure-JAX reference (mirrors the PyTorch module) + params
# ----------------------------------------------------------------------------
def reference_forward(params, x, *, num_groups=32, eps=1e-5):
    def conv(inp, wt, bias, stride):
        y = jax.lax.conv_general_dilated(
            inp, wt, window_strides=(stride, stride), padding=((1, 1), (1, 1)),
            dimension_numbers=("NCHW", "OIHW", "NCHW"))
        return y + bias[None, :, None, None]

    a = jax.nn.silu(conv(x, params["w1"], params["b1"], 1))
    x_skip = jax.nn.silu(conv(a, params["w2"], params["b2"], 1))
    bsz, c, h, w = a.shape
    gshaped = a.reshape(bsz, num_groups, c // num_groups, h, w)
    mean = gshaped.mean(axis=(2, 3, 4), keepdims=True)
    var = gshaped.var(axis=(2, 3, 4), keepdims=True)
    n = ((gshaped - mean) * jax.lax.rsqrt(var + eps)).reshape(bsz, c, h, w)
    n = n * params["gamma"][None, :, None, None] + params["beta"][None, :, None, None]
    out = jax.nn.silu(conv(n, params["w3"], params["b3"], 2))
    return out, x_skip


def init_params(key, input_size, output_size):
    ks = jax.random.split(key, 8)
    s = 0.1
    return {
        "w1": s * jax.random.normal(ks[0], (output_size, input_size, 3, 3), jnp.float32),
        "b1": s * jax.random.normal(ks[1], (output_size,), jnp.float32),
        "w2": s * jax.random.normal(ks[2], (output_size, output_size, 3, 3), jnp.float32),
        "b2": s * jax.random.normal(ks[3], (output_size,), jnp.float32),
        "w3": s * jax.random.normal(ks[4], (output_size, output_size, 3, 3), jnp.float32),
        "b3": s * jax.random.normal(ks[5], (output_size,), jnp.float32),
        "gamma": 1.0 + s * jax.random.normal(ks[6], (output_size,), jnp.float32),
        "beta": s * jax.random.normal(ks[7], (output_size,), jnp.float32),
    }


if __name__ == "__main__":
    key = jax.random.PRNGKey(0)
    kx, kp = jax.random.split(key)

    B, Cin, Cout, H, W = 2, 4, 32, 16, 16   # Cout must be divisible by 32 (GroupNorm)
    x = jax.random.normal(kx, (B, Cin, H, W), jnp.float32)
    params = init_params(kp, Cin, Cout)

    fwd = jax.jit(downsampling_block_2d)
    out, x_skip = fwd(params, x)
    jax.block_until_ready((out, x_skip))
    assert out.shape == (B, Cout, H // 2, W // 2), out.shape
    assert x_skip.shape == (B, Cout, H, W), x_skip.shape

    # correctness check vs pure-JAX reference (bf16 MXU operands -> loose tol)
    ref_out, ref_skip = jax.jit(reference_forward)(params, x)
    jax.block_until_ready((ref_out, ref_skip))
    assert jnp.allclose(out, ref_out, atol=5e-2, rtol=5e-2), \
        float(jnp.max(jnp.abs(out - ref_out)))
    assert jnp.allclose(x_skip, ref_skip, atol=5e-2, rtol=5e-2), \
        float(jnp.max(jnp.abs(x_skip - ref_skip)))

    print("KERNEL_OK")
</pallas_src>

<mosaic_0001>
module attributes {stable_mosaic.version = 11 : i64} {
  func.func @_conv_s1_kernel(%arg0: i32, %arg1: i32, %arg2: memref<1x10x16x12xbf16, #tpu.memory_space<vmem>>, %arg3: memref<3x12x32xbf16, #tpu.memory_space<vmem>>, %arg4: memref<1x32xf32, #tpu.memory_space<vmem>>, %arg5: memref<1x8x16x32xbf16, #tpu.memory_space<vmem>>, %arg6: memref<1x2x32xf32, #tpu.memory_space<vmem>>) attributes {dimension_semantics = [#tpu.dimension_semantics<parallel>, #tpu.dimension_semantics<arbitrary>], iteration_bounds = array<i64: 2, 2>, scalar_prefetch = 0 : i64, scratch_operands = 0 : i64, tpu.core_type = #tpu.core_type<tc>, window_params = [{transform_indices = @transform_0, window_bounds = array<i64: 1, 10, 16, 12>}, {pipeline_mode = #tpu.pipeline_mode<synchronous>, transform_indices = @transform_1, window_bounds = array<i64: 3, 12, 32>}, {pipeline_mode = #tpu.pipeline_mode<synchronous>, transform_indices = @transform_2, window_bounds = array<i64: 1, 32>}, {transform_indices = @transform_3, window_bounds = array<i64: 1, 8, 16, 32>}, {transform_indices = @transform_4, window_bounds = array<i64: 1, 2, 32>}]} {
    %c0 = arith.constant 0 : index
    %c0_0 = arith.constant 0 : index
    %c0_1 = arith.constant 0 : index
    %c0_2 = arith.constant 0 : index
    %0 = vector.load %arg2[%c0, %c0_0, %c0_1, %c0_2] : memref<1x10x16x12xbf16, #tpu.memory_space<vmem>>, vector<1x10x16x12xbf16>
    %1 = vector.shape_cast %0 : vector<1x10x16x12xbf16> to vector<10x16x12xbf16>
    %cst = arith.constant 0.000000e+00 : f32
    %2 = vector.broadcast %cst : f32 to vector<128x32xf32>
    %3 = vector.extract_strided_slice %1 {offsets = [0, 0, 0], sizes = [8, 16, 12], strides = [1, 1, 1]} : vector<10x16x12xbf16> to vector<8x16x12xbf16>
    %4 = vector.shape_cast %3 : vector<8x16x12xbf16> to vector<128x12xbf16>
    %c0_3 = arith.constant 0 : index
    %c0_4 = arith.constant 0 : index
    %c0_5 = arith.constant 0 : index
    %5 = vector.load %arg3[%c0_3, %c0_4, %c0_5] : memref<3x12x32xbf16, #tpu.memory_space<vmem>>, vector<1x12x32xbf16>
    %6 = vector.shape_cast %5 : vector<1x12x32xbf16> to vector<12x32xbf16>
    %cst_6 = arith.constant dense<0.000000e+00> : vector<128x32xf32>
    %7 = tpu.matmul %4, %6, %cst_6 {dimension_numbers = #tpu.dot_dimension_numbers<[1], [0], [0], [1], [0, 0, 1, 1], [], []>} : vector<128x12xbf16>, vector<12x32xbf16>, vector<128x32xf32> -> vector<128x32xf32>
    %8 = arith.addf %2, %7 : vector<128x32xf32>
    %9 = vector.extract_strided_slice %1 {offsets = [1, 0, 0], sizes = [8, 16, 12], strides = [1, 1, 1]} : vector<10x16x12xbf16> to vector<8x16x12xbf16>
    %10 = vector.shape_cast %9 : vector<8x16x12xbf16> to vector<128x12xbf16>
    %c1 = arith.constant 1 : index
    %c0_7 = arith.constant 0 : index
    %c0_8 = arith.constant 0 : index
    %11 = vector.load %arg3[%c1, %c0_7, %c0_8] : memref<3x12x32xbf16, #tpu.memory_space<vmem>>, vector<1x12x32xbf16>
    %12 = vector.shape_cast %11 : vector<1x12x32xbf16> to vector<12x32xbf16>
    %cst_9 = arith.constant dense<0.000000e+00> : vector<128x32xf32>
    %13 = tpu.matmul %10, %12, %cst_9 {dimension_numbers = #tpu.dot_dimension_numbers<[1], [0], [0], [1], [0, 0, 1, 1], [], []>} : vector<128x12xbf16>, vector<12x32xbf16>, vector<128x32xf32> -> vector<128x32xf32>
    %14 = arith.addf %8, %13 : vector<128x32xf32>
    %15 = vector.extract_strided_slice %1 {offsets = [2, 0, 0], sizes = [8, 16, 12], strides = [1, 1, 1]} : vector<10x16x12xbf16> to vector<8x16x12xbf16>
    %16 = vector.shape_cast %15 : vector<8x16x12xbf16> to vector<128x12xbf16>
    %c2 = arith.constant 2 : index
    %c0_10 = arith.constant 0 : index
    %c0_11 = arith.constant 0 : index
    %17 = vector.load %arg3[%c2, %c0_10, %c0_11] : memref<3x12x32xbf16, #tpu.memory_space<vmem>>, vector<1x12x32xbf16>
    %18 = vector.shape_cast %17 : vector<1x12x32xbf16> to vector<12x32xbf16>
    %cst_12 = arith.constant dense<0.000000e+00> : vector<128x32xf32>
    %19 = tpu.matmul %16, %18, %cst_12 {dimension_numbers = #tpu.dot_dimension_numbers<[1], [0], [0], [1], [0, 0, 1, 1], [], []>} : vector<128x12xbf16>, vector<12x32xbf16>, vector<128x32xf32> -> vector<128x32xf32>
    %20 = arith.addf %14, %19 : vector<128x32xf32>
    %c0_13 = arith.constant 0 : index
    %c0_14 = arith.constant 0 : index
    %21 = vector.load %arg4[%c0_13, %c0_14] : memref<1x32xf32, #tpu.memory_space<vmem>>, vector<1x32xf32>
    %22 = vector.broadcast %21 : vector<1x32xf32> to vector<128x32xf32>
    %23 = arith.addf %20, %22 : vector<128x32xf32>
    %24 = arith.negf %23 : vector<128x32xf32>
    %25 = math.exp %24 : vector<128x32xf32>
    %cst_15 = arith.constant 1.000000e+00 : f32
    %26 = vector.broadcast %cst_15 : f32 to vector<128x32xf32>
    %27 = arith.addf %26, %25 : vector<128x32xf32>
    %28 = arith.divf %26, %27 : vector<128x32xf32>
    %29 = arith.mulf %23, %28 : vector<128x32xf32>
    %30 = vector.shape_cast %29 : vector<128x32xf32> to vector<8x16x32xf32>
    %31 = arith.truncf %30 : vector<8x16x32xf32> to vector<8x16x32xbf16>
    %c0_16 = arith.constant 0 : index
    %c0_17 = arith.constant 0 : index
    %c0_18 = arith.constant 0 : index
    %c0_19 = arith.constant 0 : index
    %32 = vector.load %arg5[%c0_16, %c0_17, %c0_18, %c0_19] : memref<1x8x16x32xbf16, #tpu.memory_space<vmem>>, vector<1x8x16x32xbf16>
    %33 = vector.shape_cast %32 : vector<1x8x16x32xbf16> to vector<8x16x32xbf16>
    %34 = vector.shape_cast %31 : vector<8x16x32xbf16> to vector<1x8x16x32xbf16>
    tpu.vector_store %arg5[%c0_16, %c0_17, %c0_18, %c0_19], %34 {strides = array<i32>} : memref<1x8x16x32xbf16, #tpu.memory_space<vmem>>, vector<1x8x16x32xbf16>,
    %c0_i32 = arith.constant 0 : i32
    %35 = arith.cmpi eq, %arg1, %c0_i32 : i32
    %36 = arith.extui %35 : i1 to i32
    %c0_i32_20 = arith.constant 0 : i32
    %37 = arith.cmpi ne, %36, %c0_i32_20 : i32
    scf.if %37 {
      %cst_29 = arith.constant 0.000000e+00 : f32
      %50 = vector.broadcast %cst_29 : f32 to vector<1x2x32xf32>
      %c0_30 = arith.constant 0 : index
      %c0_31 = arith.constant 0 : index
      %c0_32 = arith.constant 0 : index
      %51 = vector.load %arg6[%c0_30, %c0_31, %c0_32] : memref<1x2x32xf32, #tpu.memory_space<vmem>>, vector<1x2x32xf32>
      tpu.vector_store %arg6[%c0_30, %c0_31, %c0_32], %50 {strides = array<i32>} : memref<1x2x32xf32, #tpu.memory_space<vmem>>, vector<1x2x32xf32>,
    } else {
    }
    %cst_21 = arith.constant dense<0.000000e+00> : vector<32xf32>
    %38 = vector.multi_reduction <add>, %29, %cst_21 [0] : vector<128x32xf32> to vector<32xf32>
    %39 = vector.shape_cast %38 : vector<32xf32> to vector<1x32xf32>
    %40 = arith.mulf %29, %29 : vector<128x32xf32>
    %cst_22 = arith.constant dense<0.000000e+00> : vector<32xf32>
    %41 = vector.multi_reduction <add>, %40, %cst_22 [0] : vector<128x32xf32> to vector<32xf32>
    %42 = vector.shape_cast %41 : vector<32xf32> to vector<1x32xf32>
    %43 = tpu.concatenate %39, %42 in 0 : vector<1x32xf32>, vector<1x32xf32> -> vector<2x32xf32>
    %c0_23 = arith.constant 0 : index
    %c0_24 = arith.constant 0 : index
    %c0_25 = arith.constant 0 : index
    %44 = vector.load %arg6[%c0_23, %c0_24, %c0_25] : memref<1x2x32xf32, #tpu.memory_space<vmem>>, vector<1x2x32xf32>
    %45 = vector.shape_cast %44 : vector<1x2x32xf32> to vector<2x32xf32>
    %46 = arith.addf %45, %43 : vector<2x32xf32>
    %c0_26 = arith.constant 0 : index
    %c0_27 = arith.constant 0 : index
    %c0_28 = arith.constant 0 : index
    %47 = vector.load %arg6[%c0_26, %c0_27, %c0_28] : memref<1x2x32xf32, #tpu.memory_space<vmem>>, vector<1x2x32xf32>
    %48 = vector.shape_cast %47 : vector<1x2x32xf32> to vector<2x32xf32>
    %49 = vector.shape_cast %46 : vector<2x32xf32> to vector<1x2x32xf32>
    tpu.vector_store %arg6[%c0_26, %c0_27, %c0_28], %49 {strides = array<i32>} : memref<1x2x32xf32, #tpu.memory_space<vmem>>, vector<1x2x32xf32>,
    return
  }
  func.func @transform_0(%arg0: i32, %arg1: i32) -> (i32, i32, i32, i32) {
    %c2_i32 = arith.constant 2 : i32
    %0 = arith.muli %arg0, %c2_i32 : i32
    %1 = arith.addi %0, %arg1 : i32
    %c0_i32 = arith.constant 0 : i32
    %c0_i32_0 = arith.constant 0 : i32
    %c0_i32_1 = arith.constant 0 : i32
    %c0_i32_2 = arith.constant 0 : i32
    return %1, %c0_i32, %c0_i32_0, %c0_i32_1 : i32, i32, i32, i32
  }
  func.func @transform_1(%arg0: i32, %arg1: i32) -> (i32, i32, i32) {
    %c0_i32 = arith.constant 0 : i32
    %c0_i32_0 = arith.constant 0 : i32
    %c0_i32_1 = arith.constant 0 : i32
    %c0_i32_2 = arith.constant 0 : i32
    return %c0_i32, %c0_i32_0, %c0_i32_1 : i32, i32, i32
  }
  func.func @transform_2(%arg0: i32, %arg1: i32) -> (i32, i32) {
    %c0_i32 = arith.constant 0 : i32
    %c0_i32_0 = arith.constant 0 : i32
    %c0_i32_1 = arith.constant 0 : i32
    return %c0_i32, %c0_i32_0 : i32, i32
  }
  func.func @transform_3(%arg0: i32, %arg1: i32) -> (i32, i32, i32, i32) {
    %c0_i32 = arith.constant 0 : i32
    %c0_i32_0 = arith.constant 0 : i32
    %c0_i32_1 = arith.constant 0 : i32
    return %arg0, %arg1, %c0_i32, %c0_i32_0 : i32, i32, i32, i32
  }
  func.func @transform_4(%arg0: i32, %arg1: i32) -> (i32, i32, i32) {
    %c0_i32 = arith.constant 0 : i32
    %c0_i32_0 = arith.constant 0 : i32
    %c0_i32_1 = arith.constant 0 : i32
    return %arg0, %c0_i32, %c0_i32_0 : i32, i32, i32
  }
}

module attributes {stable_mosaic.version = 11 : i64} {
  func.func @_conv_s2_kernel(%arg0: i32, %arg1: i32, %arg2: memref<1x8x8x288xbf16, #tpu.memory_space<vmem>>, %arg3: memref<288x32xbf16, #tpu.memory_space<vmem>>, %arg4: memref<1x32xf32, #tpu.memory_space<vmem>>, %arg5: memref<1x8x8x32xf32, #tpu.memory_space<vmem>>) attributes {dimension_semantics = [#tpu.dimension_semantics<parallel>, #tpu.dimension_semantics<parallel>], iteration_bounds = array<i64: 2, 1>, scalar_prefetch = 0 : i64, scratch_operands = 0 : i64, tpu.core_type = #tpu.core_type<tc>, window_params = [{transform_indices = @transform_0, window_bounds = array<i64: 1, 8, 8, 288>}, {pipeline_mode = #tpu.pipeline_mode<synchronous>, transform_indices = @transform_1, window_bounds = array<i64: 288, 32>}, {pipeline_mode = #tpu.pipeline_mode<synchronous>, transform_indices = @transform_2, window_bounds = array<i64: 1, 32>}, {transform_indices = @transform_3, window_bounds = array<i64: 1, 8, 8, 32>}]} {
    %c0 = arith.constant 0 : index
    %c0_0 = arith.constant 0 : index
    %c0_1 = arith.constant 0 : index
    %c0_2 = arith.constant 0 : index
    %0 = vector.load %arg2[%c0, %c0_0, %c0_1, %c0_2] : memref<1x8x8x288xbf16, #tpu.memory_space<vmem>>, vector<1x8x8x288xbf16>
    %1 = vector.shape_cast %0 : vector<1x8x8x288xbf16> to vector<8x8x288xbf16>
    %2 = vector.shape_cast %1 : vector<8x8x288xbf16> to vector<64x288xbf16>
    %c0_3 = arith.constant 0 : index
    %c0_4 = arith.constant 0 : index
    %3 = vector.load %arg3[%c0_3, %c0_4] : memref<288x32xbf16, #tpu.memory_space<vmem>>, vector<288x32xbf16>
    %cst = arith.constant dense<0.000000e+00> : vector<64x32xf32>
    %4 = tpu.matmul %2, %3, %cst {dimension_numbers = #tpu.dot_dimension_numbers<[1], [0], [0], [1], [0, 0, 1, 1], [], []>} : vector<64x288xbf16>, vector<288x32xbf16>, vector<64x32xf32> -> vector<64x32xf32>
    %c0_5 = arith.constant 0 : index
    %c0_6 = arith.constant 0 : index
    %5 = vector.load %arg4[%c0_5, %c0_6] : memref<1x32xf32, #tpu.memory_space<vmem>>, vector<1x32xf32>
    %6 = vector.broadcast %5 : vector<1x32xf32> to vector<64x32xf32>
    %7 = arith.addf %4, %6 : vector<64x32xf32>
    %8 = arith.negf %7 : vector<64x32xf32>
    %9 = math.exp %8 : vector<64x32xf32>
    %cst_7 = arith.constant 1.000000e+00 : f32
    %10 = vector.broadcast %cst_7 : f32 to vector<64x32xf32>
    %11 = arith.addf %10, %9 : vector<64x32xf32>
    %12 = arith.divf %10, %11 : vector<64x32xf32>
    %13 = arith.mulf %7, %12 : vector<64x32xf32>
    %14 = vector.shape_cast %13 : vector<64x32xf32> to vector<8x8x32xf32>
    %c0_8 = arith.constant 0 : index
    %c0_9 = arith.constant 0 : index
    %c0_10 = arith.constant 0 : index
    %c0_11 = arith.constant 0 : index
    %15 = vector.load %arg5[%c0_8, %c0_9, %c0_10, %c0_11] : memref<1x8x8x32xf32, #tpu.memory_space<vmem>>, vector<1x8x8x32xf32>
    %16 = vector.shape_cast %15 : vector<1x8x8x32xf32> to vector<8x8x32xf32>
    %17 = vector.shape_cast %14 : vector<8x8x32xf32> to vector<1x8x8x32xf32>
    tpu.vector_store %arg5[%c0_8, %c0_9, %c0_10, %c0_11], %17 {strides = array<i32>} : memref<1x8x8x32xf32, #tpu.memory_space<vmem>>, vector<1x8x8x32xf32>,
    return
  }
  func.func @transform_0(%arg0: i32, %arg1: i32) -> (i32, i32, i32, i32) {
    %c0_i32 = arith.constant 0 : i32
    %c0_i32_0 = arith.constant 0 : i32
    %c0_i32_1 = arith.constant 0 : i32
    return %arg0, %arg1, %c0_i32, %c0_i32_0 : i32, i32, i32, i32
  }
  func.func @transform_1(%arg0: i32, %arg1: i32) -> (i32, i32) {
    %c0_i32 = arith.constant 0 : i32
    %c0_i32_0 = arith.constant 0 : i32
    %c0_i32_1 = arith.constant 0 : i32
    return %c0_i32, %c0_i32_0 : i32, i32
  }
  func.func @transform_2(%arg0: i32, %arg1: i32) -> (i32, i32) {
    %c0_i32 = arith.constant 0 : i32
    %c0_i32_0 = arith.constant 0 : i32
    %c0_i32_1 = arith.constant 0 : i32
    return %c0_i32, %c0_i32_0 : i32, i32
  }
  func.func @transform_3(%arg0: i32, %arg1: i32) -> (i32, i32, i32, i32) {
    %c0_i32 = arith.constant 0 : i32
    %c0_i32_0 = arith.constant 0 : i32
    %c0_i32_1 = arith.constant 0 : i32
    return %arg0, %arg1, %c0_i32, %c0_i32_0 : i32, i32, i32, i32
  }
}

module attributes {stable_mosaic.version = 11 : i64} {
  func.func @_conv_s1_kernel(%arg0: i32, %arg1: i32, %arg2: memref<1x10x16x96xbf16, #tpu.memory_space<vmem>>, %arg3: memref<3x96x32xbf16, #tpu.memory_space<vmem>>, %arg4: memref<1x32xf32, #tpu.memory_space<vmem>>, %arg5: memref<1x8x16x32xf32, #tpu.memory_space<vmem>>) attributes {dimension_semantics = [#tpu.dimension_semantics<parallel>, #tpu.dimension_semantics<parallel>], iteration_bounds = array<i64: 2, 2>, scalar_prefetch = 0 : i64, scratch_operands = 0 : i64, tpu.core_type = #tpu.core_type<tc>, window_params = [{transform_indices = @transform_0, window_bounds = array<i64: 1, 10, 16, 96>}, {pipeline_mode = #tpu.pipeline_mode<synchronous>, transform_indices = @transform_1, window_bounds = array<i64: 3, 96, 32>}, {pipeline_mode = #tpu.pipeline_mode<synchronous>, transform_indices = @transform_2, window_bounds = array<i64: 1, 32>}, {transform_indices = @transform_3, window_bounds = array<i64: 1, 8, 16, 32>}]} {
    %c0 = arith.constant 0 : index
    %c0_0 = arith.constant 0 : index
    %c0_1 = arith.constant 0 : index
    %c0_2 = arith.constant 0 : index
    %0 = vector.load %arg2[%c0, %c0_0, %c0_1, %c0_2] : memref<1x10x16x96xbf16, #tpu.memory_space<vmem>>, vector<1x10x16x96xbf16>
    %1 = vector.shape_cast %0 : vector<1x10x16x96xbf16> to vector<10x16x96xbf16>
    %cst = arith.constant 0.000000e+00 : f32
    %2 = vector.broadcast %cst : f32 to vector<128x32xf32>
    %3 = vector.extract_strided_slice %1 {offsets = [0, 0, 0], sizes = [8, 16, 96], strides = [1, 1, 1]} : vector<10x16x96xbf16> to vector<8x16x96xbf16>
    %4 = vector.shape_cast %3 : vector<8x16x96xbf16> to vector<128x96xbf16>
    %c0_3 = arith.constant 0 : index
    %c0_4 = arith.constant 0 : index
    %c0_5 = arith.constant 0 : index
    %5 = vector.load %arg3[%c0_3, %c0_4, %c0_5] : memref<3x96x32xbf16, #tpu.memory_space<vmem>>, vector<1x96x32xbf16>
    %6 = vector.shape_cast %5 : vector<1x96x32xbf16> to vector<96x32xbf16>
    %cst_6 = arith.constant dense<0.000000e+00> : vector<128x32xf32>
    %7 = tpu.matmul %4, %6, %cst_6 {dimension_numbers = #tpu.dot_dimension_numbers<[1], [0], [0], [1], [0, 0, 1, 1], [], []>} : vector<128x96xbf16>, vector<96x32xbf16>, vector<128x32xf32> -> vector<128x32xf32>
    %8 = arith.addf %2, %7 : vector<128x32xf32>
    %9 = vector.extract_strided_slice %1 {offsets = [1, 0, 0], sizes = [8, 16, 96], strides = [1, 1, 1]} : vector<10x16x96xbf16> to vector<8x16x96xbf16>
    %10 = vector.shape_cast %9 : vector<8x16x96xbf16> to vector<128x96xbf16>
    %c1 = arith.constant 1 : index
    %c0_7 = arith.constant 0 : index
    %c0_8 = arith.constant 0 : index
    %11 = vector.load %arg3[%c1, %c0_7, %c0_8] : memref<3x96x32xbf16, #tpu.memory_space<vmem>>, vector<1x96x32xbf16>
    %12 = vector.shape_cast %11 : vector<1x96x32xbf16> to vector<96x32xbf16>
    %cst_9 = arith.constant dense<0.000000e+00> : vector<128x32xf32>
    %13 = tpu.matmul %10, %12, %cst_9 {dimension_numbers = #tpu.dot_dimension_numbers<[1], [0], [0], [1], [0, 0, 1, 1], [], []>} : vector<128x96xbf16>, vector<96x32xbf16>, vector<128x32xf32> -> vector<128x32xf32>
    %14 = arith.addf %8, %13 : vector<128x32xf32>
    %15 = vector.extract_strided_slice %1 {offsets = [2, 0, 0], sizes = [8, 16, 96], strides = [1, 1, 1]} : vector<10x16x96xbf16> to vector<8x16x96xbf16>
    %16 = vector.shape_cast %15 : vector<8x16x96xbf16> to vector<128x96xbf16>
    %c2 = arith.constant 2 : index
    %c0_10 = arith.constant 0 : index
    %c0_11 = arith.constant 0 : index
    %17 = vector.load %arg3[%c2, %c0_10, %c0_11] : memref<3x96x32xbf16, #tpu.memory_space<vmem>>, vector<1x96x32xbf16>
    %18 = vector.shape_cast %17 : vector<1x96x32xbf16> to vector<96x32xbf16>
    %cst_12 = arith.constant dense<0.000000e+00> : vector<128x32xf32>
    %19 = tpu.matmul %16, %18, %cst_12 {dimension_numbers = #tpu.dot_dimension_numbers<[1], [0], [0], [1], [0, 0, 1, 1], [], []>} : vector<128x96xbf16>, vector<96x32xbf16>, vector<128x32xf32> -> vector<128x32xf32>
    %20 = arith.addf %14, %19 : vector<128x32xf32>
    %c0_13 = arith.constant 0 : index
    %c0_14 = arith.constant 0 : index
    %21 = vector.load %arg4[%c0_13, %c0_14] : memref<1x32xf32, #tpu.memory_space<vmem>>, vector<1x32xf32>
    %22 = vector.broadcast %21 : vector<1x32xf32> to vector<128x32xf32>
    %23 = arith.addf %20, %22 : vector<128x32xf32>
    %24 = arith.negf %23 : vector<128x32xf32>
    %25 = math.exp %24 : vector<128x32xf32>
    %cst_15 = arith.constant 1.000000e+00 : f32
    %26 = vector.broadcast %cst_15 : f32 to vector<128x32xf32>
    %27 = arith.addf %26, %25 : vector<128x32xf32>
    %28 = arith.divf %26, %27 : vector<128x32xf32>
    %29 = arith.mulf %23, %28 : vector<128x32xf32>
    %30 = vector.shape_cast %29 : vector<128x32xf32> to vector<8x16x32xf32>
    %c0_16 = arith.constant 0 : index
    %c0_17 = arith.constant 0 : index
    %c0_18 = arith.constant 0 : index
    %c0_19 = arith.constant 0 : index
    %31 = vector.load %arg5[%c0_16, %c0_17, %c0_18, %c0_19] : memref<1x8x16x32xf32, #tpu.memory_space<vmem>>, vector<1x8x16x32xf32>
    %32 = vector.shape_cast %31 : vector<1x8x16x32xf32> to vector<8x16x32xf32>
    %33 = vector.shape_cast %30 : vector<8x16x32xf32> to vector<1x8x16x32xf32>
    tpu.vector_store %arg5[%c0_16, %c0_17, %c0_18, %c0_19], %33 {strides = array<i32>} : memref<1x8x16x32xf32, #tpu.memory_space<vmem>>, vector<1x8x16x32xf32>,
    return
  }
  func.func @transform_0(%arg0: i32, %arg1: i32) -> (i32, i32, i32, i32) {
    %c2_i32 = arith.constant 2 : i32
    %0 = arith.muli %arg0, %c2_i32 : i32
    %1 = arith.addi %0, %arg1 : i32
    %c0_i32 = arith.constant 0 : i32
    %c0_i32_0 = arith.constant 0 : i32
    %c0_i32_1 = arith.constant 0 : i32
    %c0_i32_2 = arith.constant 0 : i32
    return %1, %c0_i32, %c0_i32_0, %c0_i32_1 : i32, i32, i32, i32
  }
  func.func @transform_1(%arg0: i32, %arg1: i32) -> (i32, i32, i32) {
    %c0_i32 = arith.constant 0 : i32
    %c0_i32_0 = arith.constant 0 : i32
    %c0_i32_1 = arith.constant 0 : i32
    %c0_i32_2 = arith.constant 0 : i32
    return %c0_i32, %c0_i32_0, %c0_i32_1 : i32, i32, i32
  }
  func.func @transform_2(%arg0: i32, %arg1: i32) -> (i32, i32) {
    %c0_i32 = arith.constant 0 : i32
    %c0_i32_0 = arith.constant 0 : i32
    %c0_i32_1 = arith.constant 0 : i32
    return %c0_i32, %c0_i32_0 : i32, i32
  }
  func.func @transform_3(%arg0: i32, %arg1: i32) -> (i32, i32, i32, i32) {
    %c0_i32 = arith.constant 0 : i32
    %c0_i32_0 = arith.constant 0 : i32
    %c0_i32_1 = arith.constant 0 : i32
    return %arg0, %arg1, %c0_i32, %c0_i32_0 : i32, i32, i32, i32
  }
}

</mosaic_0001>

<bundles_post_ra>
// kernel: downsampling_block_2d.3
= control target key start
LH: loop header
LB: loop body
LE: loop exit
PB: predicated region body
PF: predicated region fallthrough
CT: control target
= control target key end

     0   :  { %s1509_s15 = smov 0   ;;  %s1511_s16 = smov 0   ;;  %s1934_s0 = inlined_call_operand.vmem [shape: bf16[4,10,16,12], index: 0, kind: input, shape index: {}]   ;;  %s1935_s1 = inlined_call_operand.vmem [shape: bf16[3,12,32], index: 1, kind: input, shape index: {}]   ;;  %s1936_s2 = inlined_call_operand.vmem [shape: f32[1,32], index: 2, kind: input, shape index: {}]   ;;  %s1937_s3 = inlined_call_operand.vmem [shape: bf16[2,16,16,32], index: 3, kind: output, shape index: {0}]   ;;  %s1938_s4 = inlined_call_operand.vmem [shape: f32[2,2,32], index: 4, kind: output, shape index: {1}]  }
   0x1   :  { %s1513_s17 = smov 0   ;;  %s1515_s18 = smov 0  }
   0x2   :  { %s1517_s19 = smov 0  }
   0x3 LB: > { %s24_s20 = sadd.s32 1, %s1473_s17  ;;  %s27_s21 = sadd.s32 1, %s1477_s18  ;;  %s1481_s19 = sphi %s1517_s19, %s15_s19   ;;  %s1477_s18 = sphi %s1515_s18, %s1943_s18   ;;  %s1473_s17 = sphi %s1513_s17, %s1942_s17   ;;  %s1469_s16 = sphi %s1511_s16, %s1941_s16   ;;  %s1465_s15 = sphi %s1509_s15, %s1940_s15  }
   0x4   : > { %p25_p0 = scmp.ge.s32.totalorder %s24_s20, 2  ;;  %p1136_p1 = scmp.ge.s32.totalorder %s1481_s19, 1 }
   0x5   : > { %p187_p2 = scmp.lt.s32.totalorder %s1481_s19, 5 }
   0x6   : > { %s1945_s20 = smov (%p25_p0, %s24_s20), 0  ;;  %s1947_s21 = smov (!%p25_p0, %s27_s21), %s1477_s18 }
   0x7   : > { %p188_p3 = pnand %p1136_p1, %p187_p2  ;;  %p29_p4 = scmp.ge.s32.totalorder %s1947_s21, 2 }
   0x8   : > { %s1137_s24 = sshll.u32 (!%p188_p3), %s1469_s16, 1  ;;  %p234_p6 = scmp.lt.s32.totalorder (!%p188_p3), %s1469_s16, 1 }
   0x9   : > { %s1949_s21 = smov (%p29_p4, %s1947_s21), 0  ;;  %191 = sbr.rel (%p188_p3) target bundleno = 356 (0x164), region = 32 }
   0xa   : > { %s225_s25 = sadd.s32 (!%p188_p3), %s1465_s15, %s1137_s24  ;;  %s1139_s14 = sshll.u32 (!%p188_p3), %s1465_s15, 3 }
   0xb   : > { %p226_p5 = scmp.lt.s32.totalorder (!%p188_p3), %s225_s25, 3  ;;  %p1672_p7 = scmp.lt.s32.totalorder (!%p188_p3), %s1139_s14, 15 }
   0xc   : > { %p1218_p8 = scmp.ne.s32.totalorder (!%p188_p3), %s1465_s15, 0 }
   0xe   : > { %v1366_v0 = vld [vmem:[%s1935_s1 + $0x8] sm:$0x3f]   ;;  %vm344_vm0 = vcmask 1045504   ;;  %v1369_v2 = vld [vmem:[%s1935_s1] sm:$0x3f]   ;;  %s1951_s25 = smov (!%p226_p5, %s225_s25), 3 }
   0xf   : > { %1321 = vmatprep.subr.msk.bf16.mxu1 %vm344_vm0, %v1366_v0  ;;  %1320 = vmatprep.subr.msk.bf16.mxu0 %vm344_vm0, %v1366_v0  ;;  %v346_v1 = vsel %vm344_vm0, %v1366_v0, 0  ;;  %v1372_v3 = vld [vmem:[%s1935_s1 + $0x10] sm:$0x3f]   ;;  %s1324_s30 = smul.u32 80, %s1951_s25  ;;  %vm319_vm1 = vcmask 97280   ;;  %v459_v9 = vsel %vm344_vm0, %v1369_v2, 0 }
  0x10   : > { %1319 = vmatpush3.bf16.msra.mxu1 %v346_v1  ;;  %1265 = vmatpush3.bf16.msra.mxu0 %v346_v1  ;;  %v575_v7 = vsel %vm344_vm0, %v1372_v3, 0  ;;  %s1953_s16 = smov (!%p234_p6, %s1469_s16), 1  ;;  %v1629_v36 = vld [vmem:[%s1936_s2] ss:$0 sm:$0xff]  ;;  %s1955_s14 = smov (!%p1672_p7, %s1139_s14), 15  ;;  %vm889_vm2 = vcmask 257024  }
  0x11   : > { %1322 = vmatprep.subr.msk.bf16.mxu1 %vm344_vm0, %v1369_v2  ;;  %1323 = vmatprep.subr.msk.bf16.mxu0 %vm344_vm0, %v1372_v3  ;;  %s1562_s7 = scalar_lea.vmem %s1934_s0, %s1324_s30  ;;  %s1143_s8 = sshll.u32 %s1953_s16, 1 }
  0x12   : > { %v1367_v4 = vld [vmem:[%s1562_s7 + $0x8] sm:$0xff]   ;;  %v1370_v6 = vld [vmem:[%s1562_s7 + $0x10] sm:$0xff]   ;;  %v1373_v10 = vld [vmem:[%s1562_s7 + $0x18] sm:$0xff]   ;;  %s1608_s11 = scalar_lea.vmem %s1938_s4, %s1143_s8  ;;  %s1140_s23 = sshll.u32 %s1955_s14, 1 }
  0x13   : > { %v1368_v5 = vld [vmem:[%s1562_s7 + $0x28] sm:$0xff]   ;;  %1266 = vmatprep.mubr.msk.bf16.mxu0 %vm319_vm1, %v1367_v4  ;;  %v1371_v8 = vld [vmem:[%s1562_s7 + $0x30] sm:$0xff]   ;;  %v1374_v11 = vld [vmem:[%s1562_s7 + $0x38] sm:$0xff]   ;;  %s1141_s24 = sshll.u32 %s1953_s16, 5 }
  0x14   : > { %1274 = vmatprep.mubr.msk.bf16.mxu1 %vm319_vm1, %v1368_v5  ;;  %1267 = vmatmul.mubr.msk.bf16.vlgmr.msra.gmra.mxu0 %vm319_vm1, %v1370_v6  ;;  %v1375_v12 = vld [vmem:[%s1562_s7 + $0x20] sm:$0xff]   ;;  %v1378_v15 = vld [vmem:[%s1562_s7 + $0x48] sm:$0xff]   ;;  %s240_s16 = sadd.s32 %s1141_s24, %s1140_s23 }
  0x15   : > { %1275 = vmatmul.mubr.msk.bf16.vlgmr.msra.gmra.mxu1 %vm319_vm1, %v1371_v8  ;;  %1301 = vmatpush3.bf16.msra.mxu0 %v575_v7  ;;  %v1376_v13 = vld [vmem:[%s1562_s7 + $0x40] sm:$0xff]   ;;  %s1142_s25 = sshll.u32 %s240_s16, 2 }
  0x16   : > { %1283 = vmatpush3.bf16.msra.mxu1 %v459_v9  ;;  %1270 = vmatprep.mubr.msk.bf16.mxu0 %vm319_vm1, %v1373_v10  ;;  %v1377_v14 = vld [vmem:[%s1562_s7] sm:$0xff]   ;;  %s1724_s28 = scalar_lea.vmem %s1937_s3, %s1142_s25 }
  0x17   : > { %1278 = vmatprep.mubr.msk.bf16.mxu1 %vm319_vm1, %v1374_v11 }
  0x1c   : > { %1271 = vmatmul.mubr.msk.bf16.gmra.mxu0 %vm319_vm1, %v1375_v12 }
  0x1d   : > { %1279 = vmatmul.mubr.msk.bf16.gmra.mxu1 %vm319_vm1, %v1376_v13  ;;  %1302 = vmatprep.mubr.msk.bf16.mxu0 %vm319_vm1, %v1370_v6 }
  0x1e   : > { %1284 = vmatprep.mubr.msk.bf16.mxu1 %vm319_vm1, %v1377_v14 }
  0x24   : > { %1303 = vmatmul.mubr.msk.bf16.vlgmr.msra.gmra.mxu0 %vm319_vm1, %v1373_v10 }
  0x25   : > { %1285 = vmatmul.mubr.msk.bf16.vlgmr.msra.gmra.mxu1 %vm319_vm1, %v1367_v4  ;;  %1306 = vmatprep.mubr.msk.bf16.mxu0 %vm319_vm1, %v1375_v12 }
  0x26   : > { %1288 = vmatprep.mubr.msk.bf16.mxu1 %vm319_vm1, %v1370_v6 }
  0x2c   : > { %1307 = vmatmul.mubr.msk.bf16.gmra.mxu0 %vm319_vm1, %v1368_v5 }
  0x2d   : > { %1289 = vmatmul.mubr.msk.bf16.gmra.mxu1 %vm319_vm1, %v1373_v10  ;;  %1310 = vmatprep.mubr.msk.bf16.mxu0 %vm319_vm1, %v1371_v8 }
  0x2e   : > { %1292 = vmatprep.mubr.msk.bf16.mxu1 %vm319_vm1, %v1375_v12 }
  0x34   : > { %1311 = vmatmul.mubr.msk.bf16.gmra.mxu0 %vm319_vm1, %v1374_v11 }
  0x35   : > { %1293 = vmatmul.mubr.msk.bf16.gmra.mxu1 %vm319_vm1, %v1368_v5  ;;  %1314 = vmatprep.mubr.msk.bf16.mxu0 %vm319_vm1, %v1376_v13 }
  0x36   : > { %1296 = vmatprep.mubr.msk.bf16.mxu1 %vm319_vm1, %v1371_v8 }
  0x3c   : > { %1315 = vmatmul.mubr.msk.bf16.gmra.mxu0 %vm319_vm1, %v1378_v15 }
  0x3d   : > { %1297 = vmatmul.mubr.msk.bf16.gmra.mxu1 %vm319_vm1, %v1374_v11 }
  0xd4   : > { %v1268_v16 = vpop.f32.mrf.mxu0 }
  0xd5   : > { %v1610_v17 = vpop.f32.mrf.mxu1 }
  0xd6   : > { %v382_v18 = vpop.f32.mrf.mxu0 }
  0xd7   : > { %v1612_v19 = vpop.f32.mrf.mxu1 }
  0xd8   : > { %v1269_v20 = vpop.f32.mrf.mxu0 }
  0xd9   : > { %v1614_v21 = vpop.f32.mrf.mxu1 }
  0xda   : > { %v385_v22 = vpop.f32.mrf.mxu0 }
  0xdb   : > { %v1616_v23 = vpop.f32.mrf.mxu1 }
  0xdc   : > { %v1272_v24 = vpop.f32.mrf.mxu0 }
  0xdd   : > { %v1618_v25 = vpop.f32.mrf.mxu1 }
  0xde   : > { %v398_v26 = vpop.f32.mrf.mxu0 }
  0xdf   : > { %v1620_v27 = vpop.f32.mrf.mxu1 }
  0xe0   : > { %v1273_v28 = vpop.f32.mrf.mxu0 }
  0xe1   : > { %v1622_v29 = vpop.f32.mrf.mxu1 }
  0xe2   : > { %v401_v30 = vpop.f32.mrf.mxu0 }
  0xe3   : > { %v1624_v31 = vpop.f32.mrf.mxu1 }
  0xe4   : > { %v1304_v32 = vpop.f32.mrf.mxu0 }
  0xe5   : > { %v1286_v33 = vpop.f32.mrf.mxu1 }
  0xe6   : > { %v504_v34 = vadd.f32 %v1286_v33, %v1268_v16  ;;  %v611_v35 = vpop.f32.mrf.mxu0 }
  0xe7   : > { %v495_v37 = vpop.f32.mrf.mxu1 }
  0xe8   : > { %v676_v38 = vadd.f32 %v1304_v32, %v504_v34  ;;  %v496_v39 = vadd.f32 %v495_v37, %v382_v18  ;;  %v1305_v40 = vpop.f32.mrf.mxu0 }
  0xe9   : > { %v1287_v41 = vpop.f32.mrf.mxu1 }
  0xea   : > { %v1632_v42 = vadd.f32 %v1629_v36, %v676_v38  ;;  %v674_v43 = vadd.f32 %v611_v35, %v496_v39  ;;  %v507_v44 = vadd.f32 %v1287_v41, %v1269_v20  ;;  %v614_v45 = vpop.f32.mrf.mxu0 }
  0xeb   : > { %v498_v46 = vpop.f32.mrf.mxu1 }
  0xec   : > { %v1188_v47 = vmul.f32 -1.442695, %v1632_v42  ;;  %v1636_v48 = vadd.f32 %v1629_v36, %v674_v43  ;;  %v677_v49 = vadd.f32 %v1305_v40, %v507_v44  ;;  %v499_v50 = vadd.f32 %v498_v46, %v385_v22  ;;  %v1308_v51 = vpop.f32.mrf.mxu0 }
  0xed   : > { %v1290_v52 = vpop.f32.mrf.mxu1 }
  0xee   : > { %1379 = vpow2.f32 %v1188_v47  ;;  %v1186_v53 = vmul.f32 -1.442695, %v1636_v48  ;;  %v1640_v54 = vadd.f32 %v1629_v36, %v677_v49  ;;  %v675_v55 = vadd.f32 %v614_v45, %v499_v50  ;;  %v627_v56 = vpop.f32.mrf.mxu0 }
  0xef   : > { %v520_v57 = vadd.f32 %v1290_v52, %v1272_v24  ;;  %v511_v58 = vpop.f32.mrf.mxu1 }
  0xf0   : > { %1381 = vpow2.f32 %v1186_v53  ;;  %v1189_v59 = vmul.f32 -1.442695, %v1640_v54  ;;  %v1644_v60 = vadd.f32 %v1629_v36, %v675_v55  ;;  %v512_v61 = vadd.f32 %v511_v58, %v398_v26  ;;  %v1309_v62 = vpop.f32.mrf.mxu0 }
  0xf1   : > { %v680_v63 = vadd.f32 %v1308_v51, %v520_v57  ;;  %v1291_v0 = vpop.f32.mrf.mxu1 }
  0xf2   : > { %1383 = vpow2.f32 %v1189_v59  ;;  %v1187_v1 = vmul.f32 -1.442695, %v1644_v60  ;;  %v678_v2 = vadd.f32 %v627_v56, %v512_v61  ;;  %v523_v3 = vadd.f32 %v1291_v0, %v1273_v28  ;;  %v630_v4 = vpop.f32.mrf.mxu0 }
  0xf3   : > { %v1648_v5 = vadd.f32 %v1629_v36, %v680_v63  ;;  %v514_v6 = vpop.f32.mrf.mxu1 }
  0xf4   : > { %1385 = vpow2.f32 %v1187_v1  ;;  %v1651_v7 = vadd.f32 %v1629_v36, %v678_v2  ;;  %v681_v8 = vadd.f32 %v1309_v62, %v523_v3  ;;  %v515_v9 = vadd.f32 %v514_v6, %v401_v30  ;;  %v1312_v10 = vpop.f32.mrf.mxu0 }
  0xf5   : > { %v1192_v11 = vmul.f32 -1.442695, %v1648_v5  ;;  %v1294_v12 = vpop.f32.mrf.mxu1 }
  0xf6   : > { %v1190_v13 = vmul.f32 -1.442695, %v1651_v7  ;;  %v1656_v14 = vadd.f32 %v1629_v36, %v681_v8  ;;  %v679_v15 = vadd.f32 %v630_v4, %v515_v9  ;;  %v536_v16 = vadd.f32 %v1294_v12, %v1610_v17  ;;  %v643_v18 = vpop.f32.mrf.mxu0 }
  0xf7   : > { %1387 = vpow2.f32 %v1192_v11  ;;  %v527_v20 = vpop.f32.mrf.mxu1 }
  0xf8   : > { %1389 = vpow2.f32 %v1190_v13  ;;  %v1193_v22 = vmul.f32 -1.442695, %v1656_v14  ;;  %v1661_v24 = vadd.f32 %v1629_v36, %v679_v15  ;;  %v684_v26 = vadd.f32 %v1312_v10, %v536_v16  ;;  %v1313_v28 = vpop.f32.mrf.mxu0 }
  0xf9   : > { %v528_v30 = vadd.f32 %v527_v20, %v1612_v19  ;;  %v1295_v32 = vpop.f32.mrf.mxu1 }
  0xfa   : > { %1391 = vpow2.f32 %v1193_v22  ;;  %v1191_v33 = vmul.f32 -1.442695, %v1661_v24  ;;  %v1667_v17 = vadd.f32 %v1629_v36, %v684_v26  ;;  %v539_v34 = vadd.f32 %v1295_v32, %v1614_v21  ;;  %v646_v35 = vpop.f32.mrf.mxu0 }
  0xfb   : > { %v1380_v37 = vpop.eup %1379  ;;  %v682_v38 = vadd.f32 %v643_v18, %v528_v30  ;;  %v530_v39 = vpop.f32.mrf.mxu1 }
  0xfc   : > { %v763_v40 = vadd.f32 1.0, %v1380_v37  ;;  %1393 = vpow2.f32 %v1191_v33  ;;  %v1196_v19 = vmul.f32 -1.442695, %v1667_v17  ;;  %v685_v41 = vadd.f32 %v1313_v28, %v539_v34  ;;  %v1316_v43 = vpop.f32.mrf.mxu0 }
  0xfd   : > { %v1382_v44 = vpop.eup %1381  ;;  %v1678_v21 = vadd.f32 %v1629_v36, %v682_v38  ;;  %v531_v45 = vadd.f32 %v530_v39, %v1616_v23  ;;  %v1298_v46 = vpop.f32.mrf.mxu1 }
  0xfe   : > { %1395 = vrcp.f32 %v763_v40  ;;  %v761_v47 = vadd.f32 1.0, %v1382_v44  ;;  %v1682_v49 = vadd.f32 %v1629_v36, %v685_v41  ;;  %v552_v50 = vadd.f32 %v1298_v46, %v1618_v25  ;;  %v659_v51 = vpop.f32.mrf.mxu0 }
  0xff   : > { %v1384_v52 = vpop.eup %1383  ;;  %1397 = vpow2.f32 %v1196_v19  ;;  %v1194_v53 = vmul.f32 -1.442695, %v1678_v21  ;;  %v683_v55 = vadd.f32 %v646_v35, %v531_v45  ;;  %v543_v56 = vpop.f32.mrf.mxu1 }
 0x100   : > { %1399 = vrcp.f32 %v761_v47  ;;  %v764_v23 = vadd.f32 1.0, %v1384_v52  ;;  %v1197_v57 = vmul.f32 -1.442695, %v1682_v49  ;;  %v688_v58 = vadd.f32 %v1316_v43, %v552_v50  ;;  %v1317_v63 = vpop.f32.mrf.mxu0 }
 0x101   : > { %v1386_v59 = vpop.eup %1385  ;;  %1401 = vpow2.f32 %v1194_v53  ;;  %v1694_v25 = vadd.f32 %v1629_v36, %v683_v55  ;;  %v544_v61 = vadd.f32 %v543_v56, %v1620_v27  ;;  %v1299_v62 = vpop.f32.mrf.mxu1 }
 0x102   : > { %1403 = vrcp.f32 %v764_v23  ;;  %v762_v0 = vadd.f32 1.0, %v1386_v59  ;;  %v1698_v1 = vadd.f32 %v1629_v36, %v688_v58  ;;  %v555_v2 = vadd.f32 %v1299_v62, %v1622_v29  ;;  %v662_v29 = vpop.f32.mrf.mxu0 }
 0x103   : > { %1405 = vpow2.f32 %v1197_v57  ;;  %v1195_v3 = vmul.f32 -1.442695, %v1694_v25  ;;  %v686_v4 = vadd.f32 %v659_v51, %v544_v61  ;;  %v546_v6 = vpop.f32.mrf.mxu1 }
 0x104   : > { %v1388_v8 = vpop.eup %1387  ;;  %1407 = vrcp.f32 %v762_v0  ;;  %v1200_v27 = vmul.f32 -1.442695, %v1698_v1  ;;  %v689_v9 = vadd.f32 %v1317_v63, %v555_v2  ;;  %v547_v10 = vadd.f32 %v546_v6, %v1624_v31 }
 0x105   : > { %v1390_v11 = vpop.eup %1389  ;;  %v767_v12 = vadd.f32 1.0, %v1388_v8  ;;  %1409 = vpow2.f32 %v1195_v3  ;;  %v1707_v13 = vadd.f32 %v1629_v36, %v686_v4 }
 0x106   : > { %v765_v15 = vadd.f32 1.0, %v1390_v11  ;;  %1411 = vpow2.f32 %v1200_v27  ;;  %v1710_v16 = vadd.f32 %v1629_v36, %v689_v9  ;;  %v687_v18 = vadd.f32 %v662_v29, %v547_v10 }
 0x107   : > { %v1392_v20 = vpop.eup %1391  ;;  %1413 = vrcp.f32 %v767_v12  ;;  %v1198_v22 = vmul.f32 -1.442695, %v1707_v13 }
 0x108   : > { %1415 = vrcp.f32 %v765_v15  ;;  %v768_v31 = vadd.f32 1.0, %v1392_v20  ;;  %v1201_v26 = vmul.f32 -1.442695, %v1710_v16  ;;  %v1715_v28 = vadd.f32 %v1629_v36, %v687_v18 }
 0x109   : > { %v1394_v30 = vpop.eup %1393  ;;  %1417 = vpow2.f32 %v1198_v22 }
 0x10a   : > { %1419 = vrcp.f32 %v768_v31  ;;  %v766_v32 = vadd.f32 1.0, %v1394_v30  ;;  %v1199_v33 = vmul.f32 -1.442695, %v1715_v28 }
 0x10b   : > { %v1396_v34 = vpop.eup %1395  ;;  %1421 = vpow2.f32 %v1201_v26 }
 0x10c   : > { %v1398_v35 = vpop.eup %1397  ;;  %v1719_v37 = vmul.f32 %v1396_v34, %v1632_v42  ;;  %1423 = vrcp.f32 %v766_v32 }
 0x10d   : > { %v1400_v38 = vpop.eup %1399  ;;  %v771_v36 = vadd.f32 1.0, %v1398_v35  ;;  %1425 = vpow2.f32 %v1199_v33 }
 0x10e   : > { %v1402_v39 = vpop.eup %1401  ;;  %v1223_v40 = vpack.c.bf16 %v1719_v37, %v1719_v37  ;;  %v1729_v19 = vmul.f32 %v1400_v38, %v1636_v48 }
 0x10f   : > { %v1404_v42 = vpop.eup %1403  ;;  %1427 = vrcp.f32 %v771_v36  ;;  %v769_v41 = vadd.f32 1.0, %v1402_v39 }
 0x110   : > { %v1406_v43 = vpop.eup %1405  ;;  %892 = vst.msk [vmem:[%s1724_s28 + $0x8] sm:$0xf] %vm889_vm2, %v1223_v40  ;;  %v1221_v44 = vpack.c.bf16 %v1729_v19, %v1729_v19  ;;  %v1736_v45 = vmul.f32 %v1404_v42, %v1640_v54 }
 0x111   : > { %v1408_v46 = vpop.eup %1407  ;;  %1429 = vrcp.f32 %v769_v41  ;;  %v772_v47 = vadd.f32 1.0, %v1406_v43 }
 0x112   : > { %v1410_v50 = vpop.eup %1409  ;;  %890 = vst.msk [vmem:[%s1724_s28] sm:$0xf] %vm889_vm2, %v1221_v44  ;;  %v1224_v48 = vpack.c.bf16 %v1736_v45, %v1736_v45  ;;  %v1743_v51 = vmul.f32 %v1408_v46, %v1644_v60 }
 0x113   : > { %v1412_v52 = vpop.eup %1411  ;;  %1431 = vrcp.f32 %v772_v47  ;;  %v770_v53 = vadd.f32 1.0, %v1410_v50 }
 0x114   : > { %v1414_v55 = vpop.eup %1413  ;;  %893 = vst.msk [vmem:[%s1724_s28 + $0xc] sm:$0xf] %vm889_vm2, %v1224_v48  ;;  %v1222_v54 = vpack.c.bf16 %v1743_v51, %v1743_v51  ;;  %v775_v56 = vadd.f32 1.0, %v1412_v52 }
 0x115   : > { %v1416_v23 = vpop.eup %1415  ;;  %v1750_v57 = vmul.f32 %v1414_v55, %v1648_v5  ;;  %1433 = vrcp.f32 %v770_v53 }
 0x116   : > { %v1418_v58 = vpop.eup %1417  ;;  %891 = vst.msk [vmem:[%s1724_s28 + $0x4] sm:$0xf] %vm889_vm2, %v1222_v54  ;;  %v1755_v60 = vmul.f32 %v1416_v23, %v1651_v7  ;;  %1435 = vrcp.f32 %v775_v56 }
 0x117   : > { %v1420_v59 = vpop.eup %1419  ;;  %v1227_v61 = vpack.c.bf16 %v1750_v57, %v1750_v57  ;;  %v773_v62 = vadd.f32 1.0, %v1418_v58 }
 0x118   : > { %v1422_v63 = vpop.eup %1421  ;;  %v1225_v5 = vpack.c.bf16 %v1755_v60, %v1755_v60  ;;  %v1762_v0 = vmul.f32 %v1420_v59, %v1656_v14 }
 0x119   : > { %v1424_v2 = vpop.eup %1423  ;;  %896 = vst.msk [vmem:[%s1724_s28 + $0x18] sm:$0xf] %vm889_vm2, %v1227_v61  ;;  %1437 = vrcp.f32 %v773_v62  ;;  %v776_v7 = vadd.f32 1.0, %v1422_v63 }
 0x11a   : > { %v1426_v3 = vpop.eup %1425  ;;  %894 = vst.msk [vmem:[%s1724_s28 + $0x10] sm:$0xf] %vm889_vm2, %v1225_v5  ;;  %v1228_v4 = vpack.c.bf16 %v1762_v0, %v1762_v0  ;;  %v1771_v6 = vmul.f32 %v1424_v2, %v1661_v24 }
 0x11b   : > { %1439 = vrcp.f32 %v776_v7  ;;  %v774_v8 = vadd.f32 1.0, %v1426_v3 }
 0x11c   : > { %v1428_v14 = vpop.eup %1427  ;;  %897 = vst.msk [vmem:[%s1724_s28 + $0x1c] sm:$0xf] %vm889_vm2, %v1228_v4  ;;  %v1226_v27 = vpack.c.bf16 %v1771_v6, %v1771_v6 }
 0x11d   : > { %v1778_v9 = vmul.f32 %v1428_v14, %v1667_v17  ;;  %1441 = vrcp.f32 %v774_v8 }
 0x11e   : > { %v1430_v10 = vpop.eup %1429  ;;  %895 = vst.msk [vmem:[%s1724_s28 + $0x14] sm:$0xf] %vm889_vm2, %v1226_v27 }
 0x11f   : > { %v1231_v24 = vpack.c.bf16 %v1778_v9, %v1778_v9  ;;  %v1785_v11 = vmul.f32 %v1430_v10, %v1678_v21 }
 0x120   : > { %v1432_v12 = vpop.eup %1431 }
 0x121   : > { %900 = vst.msk [vmem:[%s1724_s28 + $0x28] sm:$0xf] %vm889_vm2, %v1231_v24  ;;  %v1229_v17 = vpack.c.bf16 %v1785_v11, %v1785_v11  ;;  %v1792_v29 = vmul.f32 %v1432_v12, %v1682_v49 }
 0x122   : > { %v1434_v15 = vpop.eup %1433 }
 0x123   : > { %v1436_v18 = vpop.eup %1435  ;;  %898 = vst.msk [vmem:[%s1724_s28 + $0x20] sm:$0xf] %vm889_vm2, %v1229_v17  ;;  %v1232_v20 = vpack.c.bf16 %v1792_v29, %v1792_v29  ;;  %v1799_v21 = vmul.f32 %v1434_v15, %v1694_v25 }
 0x124   : > { %v1802_v22 = vmul.f32 %v1436_v18, %v1698_v1 }
 0x125   : > { %901 = vst.msk [vmem:[%s1724_s28 + $0x2c] sm:$0xf] %vm889_vm2, %v1232_v20  ;;  %v1230_v49 = vpack.c.bf16 %v1799_v21, %v1799_v21 }
 0x126   : > { %v1438_v31 = vpop.eup %1437  ;;  %v1235_v26 = vpack.c.bf16 %v1802_v22, %v1802_v22 }
 0x127   : > { %899 = vst.msk [vmem:[%s1724_s28 + $0x24] sm:$0xf] %vm889_vm2, %v1230_v49  ;;  %v1813_v30 = vmul.f32 %v1438_v31, %v1707_v13 }
 0x128   : > { %v1440_v25 = vpop.eup %1439  ;;  %904 = vst.msk [vmem:[%s1724_s28 + $0x38] sm:$0xf] %vm889_vm2, %v1235_v26 }
 0x129   : > { %v1233_v1 = vpack.c.bf16 %v1813_v30, %v1813_v30  ;;  %v1820_v32 = vmul.f32 %v1440_v25, %v1710_v16 }
 0x12a   : > { %v1442_v33 = vpop.eup %1441 }
 0x12b   : > { %902 = vst.msk [vmem:[%s1724_s28 + $0x30] sm:$0xf] %vm889_vm2, %v1233_v1  ;;  %v1236_v34 = vpack.c.bf16 %v1820_v32, %v1820_v32  ;;  %v1827_v35 = vmul.f32 %v1442_v33, %v1715_v28  ;;  %909 = sbr.rel (%p1218_p8) target bundleno = 306 (0x132), region = 36 }
 0x12d   : > { %905 = vst.msk [vmem:[%s1724_s28 + $0x3c] sm:$0xf] %vm889_vm2, %v1236_v34  ;;  %v1234_v13 = vpack.c.bf16 %v1827_v35, %v1827_v35 }
 0x12f   : > { %903 = vst.msk [vmem:[%s1724_s28 + $0x34] sm:$0xf] %vm889_vm2, %v1234_v13 }
 0x130   : > { %vm910_vm3 = vcmask 254976   ;;  %v1483_v16 = vmov 0.0  }
 0x131   : > { %911 = vst.msk [vmem:[%s1608_s11] sm:$0x3] %vm910_vm3, %v1483_v16 }
 0x132 PF: > { %vm912_vm4 = vcmask 261120   ;;  %v950_v43 = vmul.f32 %v1729_v19, %v1729_v19  ;;  %v951_v44 = vmul.f32 %v1743_v51, %v1743_v51  ;;  %v952_v46 = vmul.f32 %v1719_v37, %v1719_v37 }
 0x133   : > { %v913_v28 = vsel %vm912_vm4, %v1729_v19, 0.0  ;;  %v914_v38 = vsel %vm912_vm4, %v1743_v51, 0.0  ;;  %v916_v36 = vsel %vm912_vm4, %v1719_v37, 0.0  ;;  %v918_v40 = vsel %vm912_vm4, %v1736_v45, 0.0 }
 0x134   : > { %v915_v39 = vadd.f32 %v914_v38, %v913_v28  ;;  %v920_v41 = vsel %vm912_vm4, %v1755_v60, 0.0  ;;  %v922_v50 = vsel %vm912_vm4, %v1771_v6, 0.0  ;;  %v953_v48 = vmul.f32 %v1736_v45, %v1736_v45 }
 0x135   : > { %v924_v53 = vsel %vm912_vm4, %v1750_v57, 0.0  ;;  %v954_v19 = vmul.f32 %v1755_v60, %v1755_v60  ;;  %v966_v55 = vsel %vm912_vm4, %v950_v43, 0.0  ;;  %v967_v51 = vsel %vm912_vm4, %v951_v44, 0.0 }
 0x136   : > { %v917_v42 = vadd.f32 %v916_v36, %v915_v39  ;;  %v969_v37 = vsel %vm912_vm4, %v952_v46, 0.0  ;;  %v968_v56 = vadd.f32 %v967_v51, %v966_v55  ;;  %v926_v23 = vsel %vm912_vm4, %v1762_v0, 0.0 }
 0x137   : > { %v955_v45 = vmul.f32 %v1771_v6, %v1771_v6  ;;  %v971_v58 = vsel %vm912_vm4, %v953_v48, 0.0  ;;  %v928_v60 = vsel %vm912_vm4, %v1785_v11, 0.0  ;;  %v956_v62 = vmul.f32 %v1750_v57, %v1750_v57 }
 0x138   : > { %v919_v47 = vadd.f32 %v918_v40, %v917_v42  ;;  %v970_v61 = vadd.f32 %v969_v37, %v968_v56  ;;  %v973_v63 = vsel %vm912_vm4, %v954_v19, 0.0  ;;  %v930_v7 = vsel %vm912_vm4, %v1799_v21, 0.0 }
 0x139   : > { %v957_v3 = vmul.f32 %v1762_v0, %v1762_v0  ;;  %v975_v4 = vsel %vm912_vm4, %v955_v45, 0.0  ;;  %v932_v14 = vsel %vm912_vm4, %v1778_v9, 0.0  ;;  %v958_v57 = vmul.f32 %v1785_v11, %v1785_v11 }
 0x13a   : > { %v921_v52 = vadd.f32 %v920_v41, %v919_v47  ;;  %v972_v2 = vadd.f32 %v971_v58, %v970_v61  ;;  %v977_v27 = vsel %vm912_vm4, %v956_v62, 0.0  ;;  %v934_v12 = vsel %vm912_vm4, %v1792_v29, 0.0 }
 0x13b   : > { %v959_v0 = vmul.f32 %v1799_v21, %v1799_v21  ;;  %v979_v17 = vsel %vm912_vm4, %v957_v3, 0.0  ;;  %v936_v20 = vsel %vm912_vm4, %v1813_v30, 0.0  ;;  %v960_v11 = vmul.f32 %v1778_v9, %v1778_v9 }
 0x13c   : > { %v923_v54 = vadd.f32 %v922_v50, %v921_v52  ;;  %v974_v8 = vadd.f32 %v973_v63, %v972_v2  ;;  %v981_v49 = vsel %vm912_vm4, %v958_v57, 0.0  ;;  %v938_v25 = vsel %vm912_vm4, %v1827_v35, 0.0 }
 0x13d   : > { %v961_v21 = vmul.f32 %v1792_v29, %v1792_v29  ;;  %v983_v1 = vsel %vm912_vm4, %v959_v0, 0.0  ;;  %v940_v13 = vsel %vm912_vm4, %v1802_v22, 0.0  ;;  %v962_v9 = vmul.f32 %v1813_v30, %v1813_v30 }
 0x13e   : > { %v925_v59 = vadd.f32 %v924_v53, %v923_v54  ;;  %v976_v24 = vadd.f32 %v975_v4, %v974_v8  ;;  %v985_v16 = vsel %vm912_vm4, %v960_v11, 0.0  ;;  %v942_v36 = vsel %vm912_vm4, %v1820_v32, 0.0 }
 0x13f   : > { %v963_v29 = vmul.f32 %v1827_v35, %v1827_v35  ;;  %v987_v39 = vsel %vm912_vm4, %v961_v21, 0.0  ;;  %v964_v41 = vmul.f32 %v1802_v22, %v1802_v22  ;;  %v989_v43 = vsel %vm912_vm4, %v962_v9, 0.0 }
 0x140   : > { %v927_v5 = vadd.f32 %v926_v23, %v925_v59  ;;  %v978_v18 = vadd.f32 %v977_v27, %v976_v24  ;;  %v965_v46 = vmul.f32 %v1820_v32, %v1820_v32  ;;  %vm1003_vm5 = vcmask 1040384  }
 0x141   : > { %v991_v47 = vsel %vm912_vm4, %v963_v29, 0.0  ;;  %v993_v35 = vsel %vm912_vm4, %v964_v41, 0.0  ;;  %vm1007_vm6 = vcmask 254976  }
 0x142   : > { %v929_v6 = vadd.f32 %v928_v60, %v927_v5  ;;  %v980_v26 = vadd.f32 %v979_v17, %v978_v18  ;;  %v995_v19 = vsel %vm912_vm4, %v965_v46, 0.0  ;;  %v1005_v60 = vld [vmem:[%s1608_s11] sm:$0x3] }
 0x144   : > { %v931_v10 = vadd.f32 %v930_v7, %v929_v6  ;;  %v982_v34 = vadd.f32 %v981_v49, %v980_v26 }
 0x146   : > { %v933_v15 = vadd.f32 %v932_v14, %v931_v10  ;;  %v984_v38 = vadd.f32 %v983_v1, %v982_v34 }
 0x148   : > { %v935_v31 = vadd.f32 %v934_v12, %v933_v15  ;;  %v986_v42 = vadd.f32 %v985_v16, %v984_v38 }
 0x14a   : > { %v937_v33 = vadd.f32 %v936_v20, %v935_v31  ;;  %v988_v44 = vadd.f32 %v987_v39, %v986_v42 }
 0x14c   : > { %v939_v28 = vadd.f32 %v938_v25, %v937_v33  ;;  %v990_v48 = vadd.f32 %v989_v43, %v988_v44 }
 0x14e   : > { %v941_v40 = vadd.f32 %v940_v13, %v939_v28  ;;  %v992_v53 = vadd.f32 %v991_v47, %v990_v48 }
 0x150   : > { %v943_v30 = vadd.f32 %v942_v36, %v941_v40  ;;  %v994_v22 = vadd.f32 %v993_v35, %v992_v53 }
 0x152   : > { %v944_v50 = vrot.slane %v943_v30, 4  ;;  %v996_v51 = vadd.f32 %v995_v19, %v994_v22 }
 0x154   : > { %v945_v52 = vadd.f32 %v944_v50, %v943_v30  ;;  %v997_v54 = vrot.slane %v996_v51, 4 }
 0x156   : > { %v946_v55 = vrot.slane %v945_v52, 2  ;;  %v998_v56 = vadd.f32 %v997_v54, %v996_v51 }
 0x158   : > { %v947_v37 = vadd.f32 %v946_v55, %v945_v52  ;;  %v999_v32 = vrot.slane %v998_v56, 2 }
 0x15a   : > { %v948_v23 = vrot.slane %v947_v37, 1  ;;  %v1000_v45 = vadd.f32 %v999_v32, %v998_v56 }
 0x15c   : > { %v949_v58 = vadd.f32 %v948_v23, %v947_v37  ;;  %v1001_v59 = vrot.slane %v1000_v45, 1 }
 0x15e   : > { %v1002_v61 = vadd.f32 %v1001_v59, %v1000_v45 }
 0x160   : > { %v1004_v62 = vsel %vm1003_vm5, %v949_v58, %v1002_v61 }
 0x161   : > { %v1006_v63 = vadd.f32 %v1005_v60, %v1004_v62 }
 0x163   : > { %1008 = vst.msk [vmem:[%s1608_s11] sm:$0x3] %vm1007_vm6, %v1006_v63 }
 0x164 PF: > { %s15_s19 = sadd.s32 1, %s1481_s19   ;;  %s1940_s15 = smov %s1473_s17 }
 0x165   : > { %p12_p9 = scmp.ge.s32.totalorder %s15_s19, 6   ;;  %s1941_s16 = smov %s1477_s18 }
 0x166   : > { %s1942_s17 = smov %s1945_s20  ;;  %s1943_s18 = smov %s1949_s21 }
 0x167   :  { %14 = sbr.rel (!%p12_p9) target bundleno = 3 (0x3), region = 80 }

// kernel: downsampling_block_2d.5
= control target key start
LH: loop header
LB: loop body
LE: loop exit
PB: predicated region body
PF: predicated region fallthrough
CT: control target
= control target key end

     0   :  { %8 = vsyncpa [#allocation3], 0  ;;  %s1308_s0 = inlined_call_operand.vmem [shape: bf16[2,8,8,288], index: 0, kind: input, shape index: {}]   ;;  %s1309_s1 = inlined_call_operand.vmem [shape: bf16[288,32], index: 1, kind: input, shape index: {}]   ;;  %s1310_s2 = inlined_call_operand.vmem [shape: f32[1,32], index: 2, kind: input, shape index: {}]   ;;  %s1311_s3 = inlined_call_operand.hbm [shape: f32[2,8,8,32], index: 3, kind: output, shape index: {}]  }
   0x1   :  { %10 = vsyncpa [#allocation3 + $0x1], 0  ;;  %s1091_s12 = smov 0   ;;  %s1093_s13 = smov 0  }
   0x2   :  { %s1095_s14 = smov 0   ;;  %s1097_s15 = smov 0  }
   0x3   :  { %s1099_s16 = smov 0   ;;  %s1101_s17 = smov 0  }
   0x4 LB: > { %s736_s18 = sadd.s32 4294967295, %s1066_s17   ;;  %s737_s19 = sadd.s32 4294967294, %s1066_s17   ;;  %s1066_s17 = sphi %s1101_s17, %s16_s17   ;;  %s1062_s16 = sphi %s1099_s16, %s1318_s16   ;;  %s1058_s15 = sphi %s1097_s15, %s1317_s15   ;;  %s1054_s14 = sphi %s1095_s14, %s1316_s14   ;;  %s1050_s13 = sphi %s1093_s13, %s1315_s13   ;;  %s1046_s12 = sphi %s1091_s12, %s1314_s12  }
   0x5   : > { %s28_s20 = sadd.s32 1, %s1062_s16  ;;  %s107_s21 = sadd.s32 1, %s1054_s14 }
   0x6   : > { %p30_p0 = scmp.ge.s32.totalorder %s28_s20, 2  ;;  %p117_p1 = scmp.ne.s32.totalorder %s1054_s14, %s1050_s13 }
   0x7   : > { %p118_p2 = scmp.eq.s32.totalorder %s736_s18, 1  ;;  %p123_p3 = scmp.ne.s32.totalorder %s1050_s13, %s1046_s12 }
   0x8   : > { %s1320_s20 = smov (%p30_p0, %s28_s20), 0  ;;  %p124_p5 = scmp.eq.s32.totalorder %s737_s19, 1 }
   0x9   : > { %p1131_p4 = por %p118_p2, %p117_p1  ;;  %s102_s23 = ssub.s32 %s1062_s16, %s1320_s20 }
   0xa   : > { %p740_p6 = scmp.ge.s32.totalorder %s1066_s17, 1  ;;  %p105_p7 = scmp.eq.s32.totalorder %s102_s23, 0 }
   0xb   : > { %p1138_p8 = por %p124_p5, %p123_p3  ;;  %p162_p9 = scmp.lt.s32.totalorder %s1066_s17, 3 }
   0xc   : > { %s1144_s25 = scalar_select %p105_p7, %s1054_s14, %s107_s21  }
   0xd   : > { %p163_p10 = pnand %p740_p6, %p162_p9 }
   0xe   : > { %p192_p11 = scmp.lt.s32.totalorder (!%p163_p10), %s1058_s15, 1  ;;  %s791_s11 = sshll.u32 (!%p163_p10), %s1058_s15, 10 }
   0xf   : > { %166 = sbr.rel (%p163_p10) target bundleno = 323 (0x143), region = 32  ;;  %s1256_s23 = scalar_lea.hbm (!%p163_p10), %s1311_s3, %s791_s11 }
  0x10   : > { %s1068_s27 = smov (!%p163_p10), [#allocation2]  }
  0x11   : > { %s994_s28 = sshll.u32 (!%p163_p10), %s1068_s27, 4  ;;  %s995_s28 = int_to_ptr.vmem [resolvable:$false] %s994_s28 }
  0x12   : > { %s996_s29 = scalar_lea.vmem (!%p163_p10), %s995_s28, 2048 }
  0x14   : > { %v924_v0 = vld [vmem:[%s1309_s1 + $0x78] sm:$0xff]   ;;  %v926_v2 = vld [vmem:[%s1309_s1 + $0x70] sm:$0xff]   ;;  %v928_v4 = vld [vmem:[%s1309_s1 + $0x68] sm:$0xff]   ;;  %s193_s9 = scalar_select %p192_p11, %s1058_s15, 1  ;;  %vm431_vm0 = vcmask 261120  }
  0x15   : > { %v925_v1 = vld [vmem:[%s1309_s1 + $0x38] sm:$0xff]   ;;  %792 = vmatprep.subr.bf16.mxu0 %v924_v0  ;;  %850 = vmatprep.subr.bf16.mxu1 %v924_v0  ;;  %v927_v3 = vld [vmem:[%s1309_s1 + $0x30] sm:$0xff]   ;;  %v929_v5 = vld [vmem:[%s1309_s1 + $0x28] sm:$0xff]  }
  0x16   : > { %793 = vmatpush3.bf16.msra.mxu0 %v925_v1  ;;  %858 = vmatpush3.bf16.msra.mxu1 %v925_v1  ;;  %v930_v6 = vld [vmem:[%s1309_s1 + $0x60] sm:$0xff]   ;;  %s866_s21 = smul.u32 96, %s193_s9  ;;  %v932_v8 = vld [vmem:[%s1309_s1 + $0x58] sm:$0xff]   ;;  %v934_v10 = vld [vmem:[%s1309_s1 + $0x50] sm:$0xff]  }
  0x17   : > { %794 = vmatprep.subr.bf16.mxu0 %v926_v2  ;;  %851 = vmatprep.subr.bf16.mxu1 %v926_v2  ;;  %v931_v7 = vld [vmem:[%s1309_s1 + $0x20] sm:$0xff]   ;;  %v933_v9 = vld [vmem:[%s1309_s1 + $0x18] sm:$0xff]   ;;  %v935_v13 = vld [vmem:[%s1309_s1 + $0x10] sm:$0xff]  }
  0x18   : > { %s1178_s4 = scalar_lea.vmem %s1308_s0, %s866_s21  ;;  %v936_v14 = vld [vmem:[%s1309_s1 + $0x48] sm:$0xff]   ;;  %v938_v16 = vld [vmem:[%s1309_s1 + $0x40] sm:$0xff]  }
  0x19   : > { %v942_v11 = vld [vmem:[%s1178_s4 + $0x4] ss:$12 sps:$4 sm:$0xff]   ;;  %v945_v12 = vld [vmem:[%s1178_s4 + $0x4c] ss:$12 sps:$4 sm:$0xff]   ;;  %v943_v20 = vld [vmem:[%s1178_s4 + $0x48] ss:$12 sps:$4 sm:$0xff]  }
  0x1a   : > { %795 = vmatpush3.bf16.msra.mxu0 %v927_v3  ;;  %859 = vmatpush3.bf16.msra.mxu1 %v927_v3  ;;  %v937_v15 = vld [vmem:[%s1309_s1 + $0x8] sm:$0xff]   ;;  %v939_v17 = vld [vmem:[%s1309_s1] sm:$0xff]   ;;  %v956_v28 = vld [vmem:[%s1178_s4 + $0x30] ss:$12 sps:$4 sm:$0xff]  }
  0x1b   : > { %796 = vmatprep.subr.bf16.mxu0 %v928_v4  ;;  %852 = vmatprep.subr.bf16.mxu1 %v928_v4  ;;  %v946_v18 = vld [vmem:[%s1309_s1 + $0x88] sm:$0xff]   ;;  %v947_v22 = vld [vmem:[%s1309_s1 + $0x80] sm:$0xff]   ;;  %v957_v29 = vld [vmem:[%s1178_s4 + $0x50] ss:$12 sps:$4 sm:$0xff]  }
  0x1c   : > { %476 = vmatprep.mubr.bf16.mxu0 %v942_v11  ;;  %500 = vmatprep.mubr.bf16.mxu1 %v945_v12  ;;  %v940_v19 = vld [vmem:[%s1178_s4] ss:$12 sps:$4 sm:$0xff]   ;;  %v948_v21 = vld [vmem:[%s1178_s4 + $0x1c] ss:$12 sps:$4 sm:$0xff]   ;;  %v951_v24 = vld [vmem:[%s1178_s4 + $0x18] ss:$12 sps:$4 sm:$0xff]  }
  0x1d   : > { %v950_v23 = vld [vmem:[%s1178_s4 + $0x8] ss:$12 sps:$4 sm:$0xff]   ;;  %v952_v25 = vld [vmem:[%s1178_s4 + $0x20] ss:$12 sps:$4 sm:$0xff]   ;;  %v955_v27 = vld [vmem:[%s1178_s4 + $0x38] ss:$12 sps:$4 sm:$0xff]  }
  0x1e   : > { %797 = vmatpush3.bf16.msra.mxu0 %v929_v5  ;;  %860 = vmatpush3.bf16.msra.mxu1 %v929_v5  ;;  %v953_v26 = vld [vmem:[%s1178_s4 + $0x34] ss:$12 sps:$4 sm:$0xff]   ;;  %s188_s4 = sand.u32 1, %s1050_s13  }
  0x1f   : > { %798 = vmatprep.subr.bf16.mxu0 %v930_v6  ;;  %853 = vmatprep.subr.bf16.mxu1 %v930_v6  ;;  %v743_v39 = vld [vmem:[%s1310_s2] ss:$0 sm:$0xff]  ;;  %s741_s9 = sshll.u32 %s188_s4, 6  ;;  %s1263_s26 = scalar_lea.sflag [#allocation3], %s188_s4 }
  0x20   : > { %s190_s10 = scalar_lea.vmem [#allocation2], %s741_s9 }
  0x21   : > { %s654_s18 = sshll.u32 %s190_s10, 4  ;;  %s1258_s18 = int_to_ptr.vmem [resolvable:$true] %s654_s18 }
  0x22   : > { %799 = vmatpush3.bf16.msra.mxu0 %v931_v7  ;;  %861 = vmatpush3.bf16.msra.mxu1 %v931_v7  ;;  %s990_s15 = scalar_lea.vmem %s1258_s18, 1024  ;;  %p997_p1 = scmp.lt.s32.totalorder %s1258_s18, %s995_s28 }
  0x23   : > { %800 = vmatprep.subr.bf16.mxu0 %v932_v8  ;;  %854 = vmatprep.subr.bf16.mxu1 %v932_v8  ;;  %p991_p12 = scmp.ne.s32.totalorder %s1258_s18, %s990_s15  ;;  %p998_p2 = scmp.lt.s32.totalorder %s996_s29, %s990_s15 }
  0x25   : > { %p992_p13 = pnand %p991_p12, %p1131_p4  ;;  %p999_p3 = por %p998_p2, %p997_p1 }
  0x26   : > { %801 = vmatpush3.bf16.msra.mxu0 %v933_v9  ;;  %862 = vmatpush3.bf16.msra.mxu1 %v933_v9 }
  0x27   : > { %802 = vmatprep.subr.bf16.mxu0 %v934_v10  ;;  %855 = vmatprep.subr.bf16.mxu1 %v934_v10  ;;  %p993_p0 = pneg %p992_p13 }
  0x29   : > { %p1000_p5 = pnand %p999_p3, %p993_p0 }
  0x2a   : > { %803 = vmatpush3.bf16.msra.mxu0 %v935_v13  ;;  %863 = vmatpush3.bf16.msra.mxu1 %v935_v13 }
  0x2b   : > { %804 = vmatprep.subr.bf16.mxu0 %v936_v14  ;;  %856 = vmatprep.subr.bf16.mxu1 %v936_v14 }
  0x2e   : > { %805 = vmatpush3.bf16.msra.mxu0 %v937_v15  ;;  %864 = vmatpush3.bf16.msra.mxu1 %v937_v15 }
  0x2f   : > { %806 = vmatprep.subr.bf16.mxu0 %v938_v16  ;;  %857 = vmatprep.subr.bf16.mxu1 %v938_v16 }
  0x32   : > { %807 = vmatpush3.bf16.msra.mxu0 %v939_v17  ;;  %865 = vmatpush3.bf16.msra.mxu1 %v939_v17 }
  0x33   : > { %838 = vmatprep.subr.bf16.mxu1 %v946_v18 }
  0x35   : > { %477 = vmatmul.mubr.bf16.vlgmr.msra.gmra.mxu0 %v940_v19  ;;  %501 = vmatmul.mubr.bf16.vlgmr.msra.gmra.mxu1 %v943_v20 }
  0x36   : > { %839 = vmatpush3.bf16.msra.mxu1 %v946_v18  ;;  %484 = vmatprep.mubr.bf16.mxu0 %v948_v21 }
  0x37   : > { %840 = vmatprep.subr.bf16.mxu1 %v947_v22  ;;  %842 = vmatprep.mubr.msk.bf16.mxu1 %vm431_vm0, %v950_v23 }
  0x3a   : > { %841 = vmatpush3.bf16.msra.mxu1 %v947_v22 }
  0x3d   : > { %485 = vmatmul.mubr.bf16.gmra.mxu0 %v951_v24  ;;  %843 = vmatmul.mubr.msk.bf16.vlgmr.msra.gmra.mxu1 %vm431_vm0, %v952_v25 }
  0x3e   : > { %492 = vmatprep.mubr.bf16.mxu0 %v953_v26  ;;  %846 = vmatprep.mubr.msk.bf16.mxu1 %vm431_vm0, %v955_v27 }
  0x45   : > { %493 = vmatmul.mubr.bf16.gmra.mxu0 %v956_v28  ;;  %847 = vmatmul.mubr.msk.bf16.gmra.mxu1 %vm431_vm0, %v957_v29 }
  0xf5   : > { %v808_v30 = vpop.f32.mrf.mxu0  ;;  %v826_v31 = vpop.f32.mrf.mxu1 }
  0xf7   : > { %v809_v32 = vpop.f32.mrf.mxu0  ;;  %v827_v33 = vpop.f32.mrf.mxu1 }
  0xf8   : > { %v810_v36 = vadd.f32 %v809_v32, %v808_v30  ;;  %v828_v44 = vadd.f32 %v827_v33, %v826_v31 }
  0xf9   : > { %v811_v34 = vpop.f32.mrf.mxu0  ;;  %v829_v35 = vpop.f32.mrf.mxu1 }
  0xfa   : > { %v479_v43 = vadd.f32 %v810_v36, %v743_v39  ;;  %v503_v57 = vadd.f32 %v828_v44, %v743_v39 }
  0xfb   : > { %v812_v37 = vpop.f32.mrf.mxu0  ;;  %v830_v38 = vpop.f32.mrf.mxu1 }
  0xfc   : > { %v813_v42 = vadd.f32 %v812_v37, %v811_v34  ;;  %v831_v54 = vadd.f32 %v830_v38, %v829_v35 }
  0xfd   : > { %v814_v40 = vpop.f32.mrf.mxu0  ;;  %v844_v41 = vpop.f32.mrf.mxu1 }
  0xfe   : > { %v482_v53 = vadd.f32 %v813_v42, %v743_v39  ;;  %v506_v5 = vadd.f32 %v831_v54, %v743_v39 }
  0xff   : > { %v815_v45 = vpop.f32.mrf.mxu0  ;;  %v543_v46 = vpop.f32.mrf.mxu1 }
 0x100   : > { %v816_v47 = vadd.f32 %v815_v45, %v814_v40  ;;  %v1226_v48 = vadd.f32 %v543_v46, %v479_v43 }
 0x101   : > { %v817_v49 = vpop.f32.mrf.mxu0  ;;  %v845_v50 = vpop.f32.mrf.mxu1 }
 0x102   : > { %v487_v51 = vadd.f32 %v816_v47, %v743_v39  ;;  %v778_v52 = vmul.f32 -1.442695, %v1226_v48 }
 0x103   : > { %v818_v55 = vpop.f32.mrf.mxu0  ;;  %v546_v56 = vpop.f32.mrf.mxu1 }
 0x104   : > { %v1229_v58 = vadd.f32 %v844_v41, %v487_v51  ;;  %958 = vpow2.f32 %v778_v52  ;;  %v819_v59 = vadd.f32 %v818_v55, %v817_v49  ;;  %v1231_v60 = vadd.f32 %v546_v56, %v482_v53 }
 0x105   : > { %v820_v61 = vpop.f32.mrf.mxu0  ;;  %v848_v62 = vpop.f32.mrf.mxu1 }
 0x106   : > { %v780_v63 = vmul.f32 -1.442695, %v1229_v58  ;;  %v490_v0 = vadd.f32 %v819_v59, %v743_v39  ;;  %v779_v1 = vmul.f32 -1.442695, %v1231_v60  ;;  %v1235_v2 = vadd.f32 %v848_v62, %v503_v57 }
 0x107   : > { %v821_v3 = vpop.f32.mrf.mxu0  ;;  %v559_v4 = vpop.f32.mrf.mxu1 }
 0x108   : > { %960 = vpow2.f32 %v780_v63  ;;  %v555_v6 = vadd.f32 %v845_v50, %v490_v0  ;;  %v784_v7 = vmul.f32 -1.442695, %v1235_v2  ;;  %v822_v8 = vadd.f32 %v821_v3, %v820_v61 }
 0x109   : > { %962 = vpow2.f32 %v779_v1  ;;  %v823_v9 = vpop.f32.mrf.mxu0  ;;  %v849_v10 = vpop.f32.mrf.mxu1 }
 0x10a   : > { %v781_v11 = vmul.f32 -1.442695, %v555_v6  ;;  %964 = vpow2.f32 %v784_v7  ;;  %v495_v12 = vadd.f32 %v822_v8, %v743_v39  ;;  %v571_v13 = vadd.f32 %v849_v10, %v506_v5 }
 0x10b   : > { %v824_v14 = vpop.f32.mrf.mxu0  ;;  %v562_v20 = vpop.f32.mrf.mxu1 }
 0x10c   : > { %966 = vpow2.f32 %v781_v11  ;;  %v560_v15 = vadd.f32 %v559_v4, %v495_v12  ;;  %v785_v16 = vmul.f32 -1.442695, %v571_v13  ;;  %v825_v17 = vadd.f32 %v824_v14, %v823_v9 }
 0x10e   : > { %v782_v18 = vmul.f32 -1.442695, %v560_v15  ;;  %968 = vpow2.f32 %v785_v16  ;;  %v498_v19 = vadd.f32 %v825_v17, %v743_v39 }
 0x110   : > { %970 = vpow2.f32 %v782_v18  ;;  %v563_v21 = vadd.f32 %v562_v20, %v498_v19 }
 0x111   : > { %v959_v22 = vpop.eup %958 }
 0x112   : > { %v598_v23 = vadd.f32 1.0, %v959_v22  ;;  %v783_v24 = vmul.f32 -1.442695, %v563_v21 }
 0x114   : > { %972 = vrcp.f32 %v598_v23 }
 0x115   : > { %v961_v25 = vpop.eup %960  ;;  %974 = vpow2.f32 %v783_v24 }
 0x116   : > { %v963_v26 = vpop.eup %962  ;;  %v600_v27 = vadd.f32 1.0, %v961_v25 }
 0x117   : > { %v965_v28 = vpop.eup %964  ;;  %v599_v29 = vadd.f32 1.0, %v963_v26 }
 0x118   : > { %976 = vrcp.f32 %v600_v27  ;;  %v604_v30 = vadd.f32 1.0, %v965_v28 }
 0x119   : > { %v967_v31 = vpop.eup %966  ;;  %978 = vrcp.f32 %v599_v29 }
 0x11a   : > { %v601_v32 = vadd.f32 1.0, %v967_v31  ;;  %980 = vrcp.f32 %v604_v30 }
 0x11b   : > { %v969_v33 = vpop.eup %968 }
 0x11c   : > { %982 = vrcp.f32 %v601_v32  ;;  %v605_v34 = vadd.f32 1.0, %v969_v33 }
 0x11d   : > { %v971_v35 = vpop.eup %970 }
 0x11e   : > { %v602_v36 = vadd.f32 1.0, %v971_v35  ;;  %984 = vrcp.f32 %v605_v34 }
 0x120   : > { %986 = vrcp.f32 %v602_v36 }
 0x121   : > { %v973_v37 = vpop.eup %972 }
 0x122   : > { %v975_v38 = vpop.eup %974  ;;  %v622_v39 = vmul.f32 %v973_v37, %v1226_v48 }
 0x123   : > { %v603_v40 = vadd.f32 1.0, %v975_v38 }
 0x124   : > { %630 = vst.msk [vmem:[%s190_s10] sm:$0xff] %vm431_vm0, %v622_v39 }
 0x125   : > { %v977_v41 = vpop.eup %976  ;;  %988 = vrcp.f32 %v603_v40 }
 0x126   : > { %v979_v42 = vpop.eup %978  ;;  %v624_v43 = vmul.f32 %v977_v41, %v1229_v58 }
 0x127   : > { %v981_v44 = vpop.eup %980  ;;  %v623_v45 = vmul.f32 %v979_v42, %v1231_v60 }
 0x128   : > { %632 = vst.msk [vmem:[%s190_s10 + $0x10] sm:$0xff] %vm431_vm0, %v624_v43  ;;  %v628_v46 = vmul.f32 %v981_v44, %v1235_v2 }
 0x129   : > { %v983_v47 = vpop.eup %982  ;;  %631 = vst.msk [vmem:[%s190_s10 + $0x8] sm:$0xff] %vm431_vm0, %v623_v45 }
 0x12a   : > { %v625_v48 = vmul.f32 %v983_v47, %v555_v6  ;;  %636 = vst.msk [vmem:[%s190_s10 + $0x30] sm:$0xff] %vm431_vm0, %v628_v46 }
 0x12b   : > { %v985_v49 = vpop.eup %984 }
 0x12c   : > { %633 = vst.msk [vmem:[%s190_s10 + $0x18] sm:$0xff] %vm431_vm0, %v625_v48  ;;  %v629_v50 = vmul.f32 %v985_v49, %v571_v13 }
 0x12d   : > { %v987_v51 = vpop.eup %986 }
 0x12e   : > { %v626_v52 = vmul.f32 %v987_v51, %v560_v15  ;;  %637 = vst.msk [vmem:[%s190_s10 + $0x38] sm:$0xff] %vm431_vm0, %v629_v50 }
 0x130   : > { %634 = vst.msk [vmem:[%s190_s10 + $0x20] sm:$0xff] %vm431_vm0, %v626_v52 }
 0x132   : > { %v989_v53 = vpop.eup %988 }
 0x133   : > { %v627_v54 = vmul.f32 %v989_v53, %v563_v21 }
 0x135   : > { %635 = vst.msk [vmem:[%s190_s10 + $0x28] sm:$0xff] %vm431_vm0, %v627_v54 }
 0x136   : > { %1003 = shalt.err (!%p1000_p5)
}
 0x137   : > { %s1004_s30 = scalar_lea.hbm %s1256_s23, 1024  ;;  %s1008_s7 = scalar_lea.hbm %s1311_s3, 2048 }
 0x138   : > { %p1005_p6 = scmp.ne.s32.totalorder %s1256_s23, %s1004_s30  ;;  %p1009_p10 = scmp.lt.s32.totalorder %s1256_s23, %s1311_s3 }
 0x139   : > { %p1010_p11 = scmp.lt.s32.totalorder %s1008_s7, %s1004_s30 }
 0x13a   : > { %p1006_p7 = pnand %p1005_p6, %p1131_p4 }
 0x13b   : > { %p1011_p12 = por %p1010_p11, %p1009_p10 }
 0x13c   : > { %p1007_p9 = pneg %p1006_p7 }
 0x13e   : > { %p1012_p13 = pnand %p1011_p12, %p1007_p9 }
 0x140   : > { %1015 = shalt.err (!%p1012_p13)
}
 0x141   : > { %s1069_s9 = smov 128   ;;  %s1070_s10 = smov 8  }
 0x142   : > { %867 = dma.vmem_to_hbm [thread:$0]  (%p1131_p4), %s1258_s18, 1024, %s1256_s23, %s1263_s26, %s1069_s9, %s1069_s9, %s1070_s10  }
 0x143 PF: > { %p873_p0 = scmp.ge.s32.totalorder %s1066_s17, 2  ;;  %s669_s11 = sand.u32 1, %s1046_s12  }
 0x144   : > { %s670_s19 = scalar_lea.sflag [#allocation3], %s669_s11 }
 0x145   : > { %p870_p1 = pnand %p873_p0, %p1138_p8 }
 0x147   : > { %p871_p2 = pneg %p870_p1 }
 0x149   : > { %1041 = dma.done.wait (%p871_p2), %s670_s19, 1024  }
 0x14a   : > { %1043 = vsyncadd (%p871_p2), %s670_s19, 4294966272  ;;  %s16_s17 = sadd.s32 1, %s1066_s17   ;;  %s1314_s12 = smov %s1050_s13 }
 0x14b   : > { %p13_p3 = scmp.ge.s32.totalorder %s16_s17, 4   ;;  %s1315_s13 = smov %s1054_s14 }
 0x14c   : > { %s1316_s14 = smov %s1144_s25  ;;  %s1317_s15 = smov %s1062_s16 }
 0x14d   : > { %s1318_s16 = smov %s1320_s20  ;;  %15 = sbr.rel (!%p13_p3) target bundleno = 4 (0x4), region = 67 }
 0x152   :  { %675 = vsyncpa [#allocation3], 1 }
 0x153   :  { %677 = vsyncpa [#allocation3 + $0x1], 1 }

// kernel: downsampling_block_2d.4
= control target key start
LH: loop header
LB: loop body
LE: loop exit
PB: predicated region body
PF: predicated region fallthrough
CT: control target
= control target key end

     0   :  { %8 = vsyncpa [#allocation3], 0  ;;  %s1884_s0 = inlined_call_operand.vmem [shape: bf16[4,10,16,96], index: 0, kind: input, shape index: {}]   ;;  %s1885_s1 = inlined_call_operand.vmem [shape: bf16[3,96,32], index: 1, kind: input, shape index: {}]   ;;  %s1886_s2 = inlined_call_operand.vmem [shape: f32[1,32], index: 2, kind: input, shape index: {}]   ;;  %s1887_s3 = inlined_call_operand.hbm [shape: f32[2,16,16,32], index: 3, kind: output, shape index: {}]  }
   0x1   :  { %10 = vsyncpa [#allocation3 + $0x1], 0  ;;  %s1530_s12 = smov 0   ;;  %s1532_s13 = smov 0  }
   0x2   :  { %s1534_s14 = smov 0   ;;  %s1536_s15 = smov 0  }
   0x3   :  { %s1538_s16 = smov 0   ;;  %s1540_s17 = smov 0  }
   0x4   :  { %s1542_s18 = smov 0   ;;  %s1544_s19 = smov 0  }
   0x5 LB: > { %s998_s20 = sadd.s32 4294967295, %s1505_s19   ;;  %s999_s21 = sadd.s32 4294967294, %s1505_s19   ;;  %s1505_s19 = sphi %s1544_s19, %s16_s19   ;;  %s1501_s18 = sphi %s1542_s18, %s1896_s18   ;;  %s1497_s17 = sphi %s1540_s17, %s1895_s17   ;;  %s1493_s16 = sphi %s1538_s16, %s1894_s16   ;;  %s1489_s15 = sphi %s1536_s15, %s1893_s15   ;;  %s1485_s14 = sphi %s1534_s14, %s1892_s14   ;;  %s1481_s13 = sphi %s1532_s13, %s1891_s13   ;;  %s1477_s12 = sphi %s1530_s12, %s1890_s12  }
   0x6   : > { %s25_s22 = sadd.s32 1, %s1497_s17  ;;  %s28_s23 = sadd.s32 1, %s1501_s18 }
   0x7   : > { %p26_p0 = scmp.ge.s32.totalorder %s25_s22, 2  ;;  %p119_p1 = scmp.ne.s32.totalorder %s1485_s14, %s1481_s13 }
   0x8   : > { %p120_p2 = scmp.eq.s32.totalorder %s998_s20, 3  ;;  %p125_p5 = scmp.ne.s32.totalorder %s1481_s13, %s1477_s12 }
   0x9   : > { %s1898_s22 = smov (%p26_p0, %s25_s22), 0  ;;  %s1900_s23 = smov (!%p26_p0, %s28_s23), %s1501_s18 }
   0xa   : > { %s105_s24 = ssub.s32 %s1497_s17, %s1898_s22  ;;  %p1581_p3 = por %p120_p2, %p119_p1 }
   0xb   : > { %p30_p4 = scmp.ge.s32.totalorder %s1900_s23, 2  ;;  %p126_p6 = scmp.eq.s32.totalorder %s999_s21, 3 }
   0xc   : > { %p1004_p7 = scmp.ge.s32.totalorder %s1505_s19, 1  ;;  %p162_p9 = scmp.lt.s32.totalorder %s1505_s19, 5 }
   0xd   : > { %s1902_s23 = smov (%p30_p4, %s1900_s23), 0  ;;  %p1590_p8 = por %p126_p6, %p125_p5 }
   0xe   : > { %s104_s27 = ssub.s32 %s1501_s18, %s1902_s23  ;;  %s109_s28 = sadd.s32 1, %s1485_s14 }
   0xf   : > { %s106_s29 = sor.u32 %s105_s24, %s104_s27  ;;  %p163_p10 = pnand %p1004_p7, %p162_p9 }
  0x10   : > { %p107_p11 = scmp.eq.s32.totalorder %s106_s29, 0  ;;  %s1006_s6 = sshll.u32 (!%p163_p10), %s1493_s16, 1 }
  0x11   : > { %166 = sbr.rel (%p163_p10) target bundleno = 339 (0x153), region = 32  ;;  %s189_s9 = sadd.s32 (!%p163_p10), %s1489_s15, %s1006_s6 }
  0x12   : > { %s1599_s30 = scalar_select %p107_p11, %s1485_s14, %s109_s28  }
  0x13   : > { %p190_p12 = scmp.lt.s32.totalorder (!%p163_p10), %s189_s9, 3  ;;  %s185_s6 = sand.u32 (!%p163_p10), 1, %s1481_s13  }
  0x14   : > { %s1005_s7 = sshll.u32 (!%p163_p10), %s185_s6, 7  ;;  %s1108_s10 = sshll.u32 (!%p163_p10), %s1489_s15, 4 }
  0x15   : > { %s1773_s8 = scalar_lea.vmem (!%p163_p10), [#allocation2], %s1005_s7  ;;  %s1104_s11 = sshll.u32 (!%p163_p10), %s1493_s16, 5 }
  0x16   : > { %v1321_v0 = vld [vmem:[%s1885_s1 + $0x58] sm:$0xff]   ;;  %v1322_v1 = vld [vmem:[%s1885_s1 + $0x28] sm:$0xff]   ;;  %v1323_v2 = vld [vmem:[%s1885_s1 + $0x50] sm:$0xff]   ;;  %s1904_s9 = smov (!%p190_p12, %s189_s9), 3  ;;  %vm320_vm0 = vcmask 785408   ;;  %vm888_vm1 = vcmask 261120   ;;  %s919_s15 = sadd.s32 %s1108_s10, %s1104_s11 }
  0x17   : > { %1151 = vmatprep.subr.bf16.mxu0 %v1321_v0  ;;  %1179 = vmatprep.subr.bf16.mxu1 %v1322_v1  ;;  %v1324_v3 = vld [vmem:[%s1885_s1 + $0x20] sm:$0xff]   ;;  %v1325_v4 = vld [vmem:[%s1885_s1 + $0x48] sm:$0xff]   ;;  %v1326_v5 = vld [vmem:[%s1885_s1 + $0x18] sm:$0xff]   ;;  %s1247_s4 = smul.u32 80, %s1904_s9  ;;  %s1105_s16 = sshll.u32 %s919_s15, 7 }
  0x18   : > { %1152 = vmatpush3.bf16.msra.mxu0 %v1321_v0  ;;  %1180 = vmatpush3.bf16.msra.mxu1 %v1322_v1  ;;  %v1327_v6 = vld [vmem:[%s1885_s1 + $0x40] sm:$0xff]   ;;  %v1328_v7 = vld [vmem:[%s1885_s1 + $0x10] sm:$0xff]   ;;  %v1329_v8 = vld [vmem:[%s1885_s1 + $0x38] sm:$0xff]   ;;  %s922_s21 = sshll.u32 %s1773_s8, 4  ;;  %s1820_s27 = scalar_lea.hbm %s1887_s3, %s1105_s16  ;;  %s1822_s21 = int_to_ptr.vmem [resolvable:$true] %s922_s21 }
  0x19   : > { %1153 = vmatprep.subr.bf16.mxu0 %v1323_v2  ;;  %1181 = vmatprep.subr.bf16.mxu1 %v1324_v3  ;;  %s1630_s20 = scalar_lea.vmem %s1884_s0, %s1247_s4  ;;  %v1330_v9 = vld [vmem:[%s1885_s1 + $0x8] sm:$0xff]   ;;  %v1331_v12 = vld [vmem:[%s1885_s1 + $0x30] sm:$0xff]   ;;  %v1332_v13 = vld [vmem:[%s1885_s1] sm:$0xff]   ;;  %s1833_s28 = scalar_lea.sflag [#allocation3], %s185_s6 }
  0x1a   : > { %v1333_v10 = vld [vmem:[%s1630_s20 + $0x8] sm:$0xff]   ;;  %v1334_v11 = vld [vmem:[%s1630_s20] sm:$0xff]   ;;  %v1335_v15 = vld [vmem:[%s1630_s20 + $0x10] sm:$0xff]   ;;  %s1413_s29 = scalar_lea.vmem %s1822_s21, 2048  ;;  %s1507_s4 = smov [#allocation2]  }
  0x1b   : > { %1163 = vmatprep.mubr.msk.bf16.mxu0 %vm320_vm0, %v1333_v10  ;;  %1191 = vmatprep.mubr.msk.bf16.mxu1 %vm320_vm0, %v1334_v11  ;;  %v1336_v14 = vld [vmem:[%s1885_s1 + $0x88] sm:$0xff]   ;;  %v1337_v16 = vld [vmem:[%s1885_s1 + $0x80] sm:$0xff]   ;;  %v1338_v17 = vld [vmem:[%s1630_s20 + $0x18] sm:$0xff]   ;;  %p1414_p13 = scmp.ne.s32.totalorder %s1822_s21, %s1413_s29 }
  0x1c   : > { %1154 = vmatpush3.bf16.msra.mxu0 %v1323_v2  ;;  %1182 = vmatpush3.bf16.msra.mxu1 %v1324_v3  ;;  %v1340_v18 = vld [vmem:[%s1885_s1 + $0x78] sm:$0xff]   ;;  %v1339_v19 = vld [vmem:[%s1630_s20 + $0x20] sm:$0xff]   ;;  %v1341_v20 = vld [vmem:[%s1630_s20 + $0x28] sm:$0xff]  }
  0x1d   : > { %1155 = vmatprep.subr.bf16.mxu0 %v1325_v4  ;;  %1183 = vmatprep.subr.bf16.mxu1 %v1326_v5  ;;  %v1343_v21 = vld [vmem:[%s1885_s1 + $0x70] sm:$0xff]   ;;  %v1344_v22 = vld [vmem:[%s1885_s1 + $0x68] sm:$0xff]   ;;  %v1345_v24 = vld [vmem:[%s1630_s20 + $0x38] sm:$0xff]   ;;  %p1415_p0 = pnand %p1414_p13, %p1581_p3 }
  0x1e   : > { %v1342_v23 = vld [vmem:[%s1630_s20 + $0x30] sm:$0xff]   ;;  %v1347_v25 = vld [vmem:[%s1885_s1 + $0x60] sm:$0xff]   ;;  %v1348_v27 = vld [vmem:[%s1630_s20 + $0x48] sm:$0xff]  }
  0x1f   : > { %v1346_v26 = vld [vmem:[%s1630_s20 + $0x40] sm:$0xff]   ;;  %p1416_p1 = pneg %p1415_p0  ;;  %s1417_s20 = sshll.u32 %s1507_s4, 4  ;;  %s1418_s20 = int_to_ptr.vmem [resolvable:$false] %s1417_s20 }
  0x20   : > { %1156 = vmatpush3.bf16.msra.mxu0 %v1325_v4  ;;  %1184 = vmatpush3.bf16.msra.mxu1 %v1326_v5  ;;  %v1699_v1 = vld [vmem:[%s1886_s2] ss:$0 sm:$0xff]  ;;  %s1419_s5 = scalar_lea.vmem %s1418_s20, 4096  ;;  %p1420_p2 = scmp.lt.s32.totalorder %s1822_s21, %s1418_s20 }
  0x21   : > { %1157 = vmatprep.subr.bf16.mxu0 %v1327_v6  ;;  %1185 = vmatprep.subr.bf16.mxu1 %v1328_v7  ;;  %p1421_p4 = scmp.lt.s32.totalorder %s1419_s5, %s1413_s29 }
  0x23   : > { %p1422_p5 = por %p1421_p4, %p1420_p2 }
  0x24   : > { %1158 = vmatpush3.bf16.msra.mxu0 %v1327_v6  ;;  %1186 = vmatpush3.bf16.msra.mxu1 %v1328_v7 }
  0x25   : > { %1159 = vmatprep.subr.bf16.mxu0 %v1329_v8  ;;  %1187 = vmatprep.subr.bf16.mxu1 %v1330_v9  ;;  %p1423_p6 = pnand %p1422_p5, %p1416_p1 }
  0x28   : > { %1160 = vmatpush3.bf16.msra.mxu0 %v1329_v8  ;;  %1188 = vmatpush3.bf16.msra.mxu1 %v1330_v9 }
  0x29   : > { %1161 = vmatprep.subr.bf16.mxu0 %v1331_v12  ;;  %1189 = vmatprep.subr.bf16.mxu1 %v1332_v13 }
  0x2c   : > { %1162 = vmatpush3.bf16.msra.mxu0 %v1331_v12  ;;  %1190 = vmatpush3.bf16.msra.mxu1 %v1332_v13 }
  0x2d   : > { %1207 = vmatprep.subr.bf16.mxu0 %v1336_v14  ;;  %1235 = vmatprep.subr.bf16.mxu1 %v1336_v14 }
  0x2f   : > { %1164 = vmatmul.mubr.msk.bf16.vlgmr.msra.gmra.mxu0 %vm320_vm0, %v1335_v15  ;;  %1192 = vmatmul.mubr.msk.bf16.vlgmr.msra.gmra.mxu1 %vm320_vm0, %v1333_v10 }
  0x30   : > { %1208 = vmatpush3.bf16.msra.mxu0 %v1336_v14  ;;  %1241 = vmatpush3.bf16.msra.mxu1 %v1336_v14 }
  0x31   : > { %1209 = vmatprep.subr.bf16.mxu0 %v1337_v16  ;;  %1236 = vmatprep.subr.bf16.mxu1 %v1337_v16 }
  0x32   : > { %1167 = vmatprep.mubr.msk.bf16.mxu0 %vm320_vm0, %v1338_v17  ;;  %1195 = vmatprep.mubr.msk.bf16.mxu1 %vm320_vm0, %v1335_v15 }
  0x34   : > { %1210 = vmatpush3.bf16.msra.mxu0 %v1337_v16  ;;  %1242 = vmatpush3.bf16.msra.mxu1 %v1337_v16 }
  0x35   : > { %1211 = vmatprep.subr.bf16.mxu0 %v1340_v18  ;;  %1237 = vmatprep.subr.bf16.mxu1 %v1340_v18 }
  0x37   : > { %1168 = vmatmul.mubr.msk.bf16.gmra.mxu0 %vm320_vm0, %v1339_v19  ;;  %1196 = vmatmul.mubr.msk.bf16.gmra.mxu1 %vm320_vm0, %v1338_v17 }
  0x38   : > { %1212 = vmatpush3.bf16.msra.mxu0 %v1340_v18  ;;  %1243 = vmatpush3.bf16.msra.mxu1 %v1340_v18 }
  0x39   : > { %1171 = vmatprep.mubr.msk.bf16.mxu0 %vm320_vm0, %v1341_v20  ;;  %1199 = vmatprep.mubr.msk.bf16.mxu1 %vm320_vm0, %v1339_v19 }
  0x3a   : > { %1213 = vmatprep.subr.bf16.mxu0 %v1343_v21  ;;  %1238 = vmatprep.subr.bf16.mxu1 %v1343_v21 }
  0x3c   : > { %1214 = vmatpush3.bf16.msra.mxu0 %v1343_v21  ;;  %1244 = vmatpush3.bf16.msra.mxu1 %v1343_v21 }
  0x3d   : > { %1215 = vmatprep.subr.bf16.mxu0 %v1344_v22  ;;  %1239 = vmatprep.subr.bf16.mxu1 %v1344_v22 }
  0x3f   : > { %1172 = vmatmul.mubr.msk.bf16.gmra.mxu0 %vm320_vm0, %v1342_v23  ;;  %1200 = vmatmul.mubr.msk.bf16.gmra.mxu1 %vm320_vm0, %v1341_v20 }
  0x40   : > { %1175 = vmatprep.mubr.msk.bf16.mxu0 %vm320_vm0, %v1345_v24  ;;  %1203 = vmatprep.mubr.msk.bf16.mxu1 %vm320_vm0, %v1342_v23 }
  0x41   : > { %1216 = vmatpush3.bf16.msra.mxu0 %v1344_v22  ;;  %1245 = vmatpush3.bf16.msra.mxu1 %v1344_v22 }
  0x42   : > { %1217 = vmatprep.subr.bf16.mxu0 %v1347_v25  ;;  %1240 = vmatprep.subr.bf16.mxu1 %v1347_v25 }
  0x45   : > { %1218 = vmatpush3.bf16.msra.mxu0 %v1347_v25  ;;  %1246 = vmatpush3.bf16.msra.mxu1 %v1347_v25 }
  0x47   : > { %1176 = vmatmul.mubr.msk.bf16.gmra.mxu0 %vm320_vm0, %v1346_v26  ;;  %1204 = vmatmul.mubr.msk.bf16.gmra.mxu1 %vm320_vm0, %v1345_v24 }
  0x48   : > { %1219 = vmatprep.mubr.msk.bf16.mxu0 %vm320_vm0, %v1335_v15  ;;  %1227 = vmatprep.mubr.msk.bf16.mxu1 %vm320_vm0, %v1342_v23 }
  0x4f   : > { %1220 = vmatmul.mubr.msk.bf16.vlgmr.msra.gmra.mxu0 %vm320_vm0, %v1338_v17  ;;  %1228 = vmatmul.mubr.msk.bf16.vlgmr.msra.gmra.mxu1 %vm320_vm0, %v1345_v24 }
  0x50   : > { %1223 = vmatprep.mubr.msk.bf16.mxu0 %vm320_vm0, %v1339_v19  ;;  %1231 = vmatprep.mubr.msk.bf16.mxu1 %vm320_vm0, %v1346_v26 }
  0x57   : > { %1224 = vmatmul.mubr.msk.bf16.gmra.mxu0 %vm320_vm0, %v1341_v20  ;;  %1232 = vmatmul.mubr.msk.bf16.gmra.mxu1 %vm320_vm0, %v1348_v27 }
  0xef   : > { %v1165_v28 = vpop.f32.mrf.mxu0  ;;  %v1193_v29 = vpop.f32.mrf.mxu1 }
  0xf0   : > { %v529_v59 = vadd.f32 %v1193_v29, %v1165_v28 }
  0xf1   : > { %v379_v30 = vpop.f32.mrf.mxu0  ;;  %v520_v31 = vpop.f32.mrf.mxu1 }
  0xf2   : > { %v521_v61 = vadd.f32 %v520_v31, %v379_v30 }
  0xf3   : > { %v1166_v32 = vpop.f32.mrf.mxu0  ;;  %v1194_v33 = vpop.f32.mrf.mxu1 }
  0xf4   : > { %v532_v62 = vadd.f32 %v1194_v33, %v1166_v32 }
  0xf5   : > { %v382_v34 = vpop.f32.mrf.mxu0  ;;  %v523_v35 = vpop.f32.mrf.mxu1 }
  0xf6   : > { %v524_v2 = vadd.f32 %v523_v35, %v382_v34 }
  0xf7   : > { %v1169_v36 = vpop.f32.mrf.mxu0  ;;  %v1197_v37 = vpop.f32.mrf.mxu1 }
  0xf8   : > { %v545_v3 = vadd.f32 %v1197_v37, %v1169_v36 }
  0xf9   : > { %v395_v38 = vpop.f32.mrf.mxu0  ;;  %v536_v39 = vpop.f32.mrf.mxu1 }
  0xfa   : > { %v537_v4 = vadd.f32 %v536_v39, %v395_v38 }
  0xfb   : > { %v1170_v40 = vpop.f32.mrf.mxu0  ;;  %v1198_v41 = vpop.f32.mrf.mxu1 }
  0xfc   : > { %v548_v7 = vadd.f32 %v1198_v41, %v1170_v40 }
  0xfd   : > { %v398_v42 = vpop.f32.mrf.mxu0  ;;  %v539_v43 = vpop.f32.mrf.mxu1 }
  0xfe   : > { %v1701_v8 = vadd.f32 %v539_v43, %v398_v42 }
  0xff   : > { %v1173_v44 = vpop.f32.mrf.mxu0  ;;  %v1201_v45 = vpop.f32.mrf.mxu1 }
 0x100   : > { %v561_v63 = vadd.f32 %v1201_v45, %v1173_v44 }
 0x101   : > { %v411_v46 = vpop.f32.mrf.mxu0  ;;  %v552_v47 = vpop.f32.mrf.mxu1 }
 0x102   : > { %v553_v9 = vadd.f32 %v552_v47, %v411_v46 }
 0x103   : > { %v1174_v48 = vpop.f32.mrf.mxu0  ;;  %v1202_v49 = vpop.f32.mrf.mxu1 }
 0x104   : > { %v564_v12 = vadd.f32 %v1202_v49, %v1174_v48 }
 0x105   : > { %v414_v50 = vpop.f32.mrf.mxu0  ;;  %v555_v51 = vpop.f32.mrf.mxu1 }
 0x106   : > { %v556_v13 = vadd.f32 %v555_v51, %v414_v50 }
 0x107   : > { %v1177_v52 = vpop.f32.mrf.mxu0  ;;  %v1205_v53 = vpop.f32.mrf.mxu1 }
 0x108   : > { %v577_v17 = vadd.f32 %v1205_v53, %v1177_v52 }
 0x109   : > { %v427_v54 = vpop.f32.mrf.mxu0  ;;  %v568_v55 = vpop.f32.mrf.mxu1 }
 0x10a   : > { %v569_v18 = vadd.f32 %v568_v55, %v427_v54 }
 0x10b   : > { %v1178_v56 = vpop.f32.mrf.mxu0  ;;  %v1206_v57 = vpop.f32.mrf.mxu1 }
 0x10c   : > { %v580_v22 = vadd.f32 %v1206_v57, %v1178_v56 }
 0x10d   : > { %v430_v58 = vpop.f32.mrf.mxu0  ;;  %v571_v60 = vpop.f32.mrf.mxu1 }
 0x10e   : > { %v572_v27 = vadd.f32 %v571_v60, %v430_v58 }
 0x10f   : > { %v1221_v0 = vpop.f32.mrf.mxu0  ;;  %v1229_v6 = vpop.f32.mrf.mxu1 }
 0x110   : > { %v739_v5 = vadd.f32 %v1221_v0, %v529_v59  ;;  %v747_v10 = vadd.f32 %v1229_v6, %v561_v63 }
 0x111   : > { %v674_v11 = vpop.f32.mrf.mxu0  ;;  %v706_v16 = vpop.f32.mrf.mxu1 }
 0x112   : > { %v1704_v14 = vadd.f32 %v1699_v1, %v739_v5  ;;  %v737_v15 = vadd.f32 %v674_v11, %v521_v61  ;;  %v1707_v19 = vadd.f32 %v1699_v1, %v747_v10  ;;  %v745_v20 = vadd.f32 %v706_v16, %v553_v9 }
 0x113   : > { %v1222_v21 = vpop.f32.mrf.mxu0  ;;  %v1230_v26 = vpop.f32.mrf.mxu1 }
 0x114   : > { %v1087_v23 = vmul.f32 -1.442695, %v1704_v14  ;;  %v1711_v24 = vadd.f32 %v1699_v1, %v737_v15  ;;  %v740_v25 = vadd.f32 %v1222_v21, %v532_v62  ;;  %v1095_v28 = vmul.f32 -1.442695, %v1707_v19 }
 0x115   : > { %v1715_v29 = vadd.f32 %v1699_v1, %v745_v20  ;;  %v748_v30 = vadd.f32 %v1230_v26, %v564_v12  ;;  %v677_v31 = vpop.f32.mrf.mxu0  ;;  %v709_v35 = vpop.f32.mrf.mxu1 }
 0x116   : > { %1349 = vpow2.f32 %v1087_v23  ;;  %v1085_v32 = vmul.f32 -1.442695, %v1711_v24  ;;  %v1719_v33 = vadd.f32 %v1699_v1, %v740_v25  ;;  %v738_v34 = vadd.f32 %v677_v31, %v524_v2 }
 0x117   : > { %1351 = vpow2.f32 %v1095_v28  ;;  %v1093_v36 = vmul.f32 -1.442695, %v1715_v29  ;;  %v1723_v37 = vadd.f32 %v1699_v1, %v748_v30  ;;  %v746_v38 = vadd.f32 %v709_v35, %v556_v13  ;;  %v1225_v39 = vpop.f32.mrf.mxu0  ;;  %v1233_v43 = vpop.f32.mrf.mxu1 }
 0x118   : > { %1353 = vpow2.f32 %v1085_v32  ;;  %v1088_v40 = vmul.f32 -1.442695, %v1719_v33  ;;  %v1727_v41 = vadd.f32 %v1699_v1, %v738_v34  ;;  %v743_v42 = vadd.f32 %v1225_v39, %v545_v3 }
 0x119   : > { %1355 = vpow2.f32 %v1093_v36  ;;  %v1096_v44 = vmul.f32 -1.442695, %v1723_v37  ;;  %v1731_v45 = vadd.f32 %v1699_v1, %v746_v38  ;;  %v751_v46 = vadd.f32 %v1233_v43, %v577_v17  ;;  %v690_v47 = vpop.f32.mrf.mxu0  ;;  %v722_v51 = vpop.f32.mrf.mxu1 }
 0x11a   : > { %1357 = vpow2.f32 %v1088_v40  ;;  %v1086_v48 = vmul.f32 -1.442695, %v1727_v41  ;;  %v1735_v49 = vadd.f32 %v1699_v1, %v743_v42  ;;  %v741_v50 = vadd.f32 %v690_v47, %v537_v4 }
 0x11b   : > { %1359 = vpow2.f32 %v1096_v44  ;;  %v1094_v52 = vmul.f32 -1.442695, %v1731_v45  ;;  %v1739_v53 = vadd.f32 %v1699_v1, %v751_v46  ;;  %v749_v54 = vadd.f32 %v722_v51, %v569_v18  ;;  %v1226_v55 = vpop.f32.mrf.mxu0  ;;  %v1234_v59 = vpop.f32.mrf.mxu1 }
 0x11c   : > { %1361 = vpow2.f32 %v1086_v48  ;;  %v1091_v56 = vmul.f32 -1.442695, %v1735_v49  ;;  %v1743_v57 = vadd.f32 %v1699_v1, %v741_v50  ;;  %v744_v58 = vadd.f32 %v1226_v55, %v548_v7 }
 0x11d   : > { %1363 = vpow2.f32 %v1094_v52  ;;  %v1099_v60 = vmul.f32 -1.442695, %v1739_v53  ;;  %v1747_v61 = vadd.f32 %v1699_v1, %v749_v54  ;;  %v752_v62 = vadd.f32 %v1234_v59, %v580_v22  ;;  %v693_v63 = vpop.f32.mrf.mxu0  ;;  %v725_v4 = vpop.f32.mrf.mxu1 }
 0x11e   : > { %1365 = vpow2.f32 %v1091_v56  ;;  %v1089_v0 = vmul.f32 -1.442695, %v1743_v57  ;;  %v1751_v2 = vadd.f32 %v1699_v1, %v744_v58  ;;  %v742_v3 = vadd.f32 %v693_v63, %v1701_v8 }
 0x11f   : > { %1367 = vpow2.f32 %v1099_v60  ;;  %v1097_v5 = vmul.f32 -1.442695, %v1747_v61  ;;  %v1756_v6 = vadd.f32 %v1699_v1, %v752_v62  ;;  %v750_v7 = vadd.f32 %v725_v4, %v572_v27 }
 0x120   : > { %1369 = vpow2.f32 %v1089_v0  ;;  %v1092_v9 = vmul.f32 -1.442695, %v1751_v2  ;;  %v1760_v10 = vadd.f32 %v1699_v1, %v742_v3 }
 0x121   : > { %1371 = vpow2.f32 %v1097_v5  ;;  %v1100_v11 = vmul.f32 -1.442695, %v1756_v6  ;;  %v1764_v12 = vadd.f32 %v1699_v1, %v750_v7 }
 0x122   : > { %1373 = vpow2.f32 %v1092_v9  ;;  %v1090_v8 = vmul.f32 -1.442695, %v1760_v10 }
 0x123   : > { %v1350_v13 = vpop.eup %1349  ;;  %1375 = vpow2.f32 %v1100_v11  ;;  %v1098_v15 = vmul.f32 -1.442695, %v1764_v12 }
 0x124   : > { %v1352_v16 = vpop.eup %1351  ;;  %v826_v17 = vadd.f32 1.0, %v1350_v13  ;;  %1377 = vpow2.f32 %v1090_v8 }
 0x125   : > { %v1354_v18 = vpop.eup %1353  ;;  %v834_v20 = vadd.f32 1.0, %v1352_v16  ;;  %1379 = vpow2.f32 %v1098_v15 }
 0x126   : > { %v1356_v21 = vpop.eup %1355  ;;  %1381 = vrcp.f32 %v826_v17  ;;  %v824_v22 = vadd.f32 1.0, %v1354_v18 }
 0x127   : > { %v1358_v23 = vpop.eup %1357  ;;  %1383 = vrcp.f32 %v834_v20  ;;  %v832_v1 = vadd.f32 1.0, %v1356_v21 }
 0x128   : > { %v1360_v25 = vpop.eup %1359  ;;  %1385 = vrcp.f32 %v824_v22  ;;  %v827_v26 = vadd.f32 1.0, %v1358_v23 }
 0x129   : > { %v1362_v27 = vpop.eup %1361  ;;  %1387 = vrcp.f32 %v832_v1  ;;  %v835_v28 = vadd.f32 1.0, %v1360_v25 }
 0x12a   : > { %v1364_v30 = vpop.eup %1363  ;;  %1389 = vrcp.f32 %v827_v26  ;;  %v825_v31 = vadd.f32 1.0, %v1362_v27 }
 0x12b   : > { %v1366_v32 = vpop.eup %1365  ;;  %1391 = vrcp.f32 %v835_v28  ;;  %v833_v34 = vadd.f32 1.0, %v1364_v30 }
 0x12c   : > { %v1368_v35 = vpop.eup %1367  ;;  %1393 = vrcp.f32 %v825_v31  ;;  %v830_v36 = vadd.f32 1.0, %v1366_v32 }
 0x12d   : > { %v1370_v38 = vpop.eup %1369  ;;  %1395 = vrcp.f32 %v833_v34  ;;  %v838_v39 = vadd.f32 1.0, %v1368_v35 }
 0x12e   : > { %v1372_v40 = vpop.eup %1371  ;;  %1397 = vrcp.f32 %v830_v36  ;;  %v828_v42 = vadd.f32 1.0, %v1370_v38 }
 0x12f   : > { %v1374_v43 = vpop.eup %1373  ;;  %1399 = vrcp.f32 %v838_v39  ;;  %v836_v44 = vadd.f32 1.0, %v1372_v40 }
 0x130   : > { %v1376_v46 = vpop.eup %1375  ;;  %1401 = vrcp.f32 %v828_v42  ;;  %v831_v47 = vadd.f32 1.0, %v1374_v43 }
 0x131   : > { %v1378_v48 = vpop.eup %1377  ;;  %1403 = vrcp.f32 %v836_v44  ;;  %v839_v50 = vadd.f32 1.0, %v1376_v46 }
 0x132   : > { %v1380_v51 = vpop.eup %1379  ;;  %1405 = vrcp.f32 %v831_v47  ;;  %v829_v52 = vadd.f32 1.0, %v1378_v48 }
 0x133   : > { %v1382_v54 = vpop.eup %1381  ;;  %1407 = vrcp.f32 %v839_v50  ;;  %v837_v55 = vadd.f32 1.0, %v1380_v51 }
 0x134   : > { %v1384_v56 = vpop.eup %1383  ;;  %v874_v58 = vmul.f32 %v1382_v54, %v1704_v14  ;;  %1409 = vrcp.f32 %v829_v52 }
 0x135   : > { %v1386_v59 = vpop.eup %1385  ;;  %v882_v60 = vmul.f32 %v1384_v56, %v1707_v19  ;;  %1411 = vrcp.f32 %v837_v55 }
 0x136   : > { %v1388_v62 = vpop.eup %1387  ;;  %891 = vst.msk [vmem:[%s1773_s8 + $0x10] sm:$0xff] %vm888_vm1, %v874_v58  ;;  %v872_v63 = vmul.f32 %v1386_v59, %v1711_v24 }
 0x137   : > { %v1390_v14 = vpop.eup %1389  ;;  %899 = vst.msk [vmem:[%s1773_s8 + $0x50] sm:$0xff] %vm888_vm1, %v882_v60  ;;  %v880_v19 = vmul.f32 %v1388_v62, %v1715_v29 }
 0x138   : > { %v1392_v0 = vpop.eup %1391  ;;  %889 = vst.msk [vmem:[%s1773_s8] sm:$0xff] %vm888_vm1, %v872_v63  ;;  %v875_v3 = vmul.f32 %v1390_v14, %v1719_v33 }
 0x139   : > { %v1394_v4 = vpop.eup %1393  ;;  %897 = vst.msk [vmem:[%s1773_s8 + $0x40] sm:$0xff] %vm888_vm1, %v880_v19  ;;  %v883_v5 = vmul.f32 %v1392_v0, %v1723_v37 }
 0x13a   : > { %v1396_v24 = vpop.eup %1395  ;;  %892 = vst.msk [vmem:[%s1773_s8 + $0x18] sm:$0xff] %vm888_vm1, %v875_v3  ;;  %v873_v29 = vmul.f32 %v1394_v4, %v1727_v41 }
 0x13b   : > { %v1398_v7 = vpop.eup %1397  ;;  %900 = vst.msk [vmem:[%s1773_s8 + $0x58] sm:$0xff] %vm888_vm1, %v883_v5  ;;  %v881_v33 = vmul.f32 %v1396_v24, %v1731_v45 }
 0x13c   : > { %v1400_v9 = vpop.eup %1399  ;;  %890 = vst.msk [vmem:[%s1773_s8 + $0x8] sm:$0xff] %vm888_vm1, %v873_v29  ;;  %v878_v37 = vmul.f32 %v1398_v7, %v1735_v49 }
 0x13d   : > { %v1402_v11 = vpop.eup %1401  ;;  %898 = vst.msk [vmem:[%s1773_s8 + $0x48] sm:$0xff] %vm888_vm1, %v881_v33  ;;  %v886_v8 = vmul.f32 %v1400_v9, %v1739_v53 }
 0x13e   : > { %v1404_v41 = vpop.eup %1403  ;;  %895 = vst.msk [vmem:[%s1773_s8 + $0x30] sm:$0xff] %vm888_vm1, %v878_v37  ;;  %v876_v13 = vmul.f32 %v1402_v11, %v1743_v57 }
 0x13f   : > { %v1406_v45 = vpop.eup %1405  ;;  %903 = vst.msk [vmem:[%s1773_s8 + $0x70] sm:$0xff] %vm888_vm1, %v886_v8  ;;  %v884_v15 = vmul.f32 %v1404_v41, %v1747_v61 }
 0x140   : > { %v1408_v49 = vpop.eup %1407  ;;  %893 = vst.msk [vmem:[%s1773_s8 + $0x20] sm:$0xff] %vm888_vm1, %v876_v13  ;;  %v879_v53 = vmul.f32 %v1406_v45, %v1751_v2 }
 0x141   : > { %v1410_v16 = vpop.eup %1409  ;;  %901 = vst.msk [vmem:[%s1773_s8 + $0x60] sm:$0xff] %vm888_vm1, %v884_v15  ;;  %v887_v57 = vmul.f32 %v1408_v49, %v1756_v6 }
 0x142   : > { %v1412_v17 = vpop.eup %1411  ;;  %896 = vst.msk [vmem:[%s1773_s8 + $0x38] sm:$0xff] %vm888_vm1, %v879_v53  ;;  %v877_v61 = vmul.f32 %v1410_v16, %v1760_v10 }
 0x143   : > { %904 = vst.msk [vmem:[%s1773_s8 + $0x78] sm:$0xff] %vm888_vm1, %v887_v57  ;;  %v885_v2 = vmul.f32 %v1412_v17, %v1764_v12 }
 0x144   : > { %894 = vst.msk [vmem:[%s1773_s8 + $0x28] sm:$0xff] %vm888_vm1, %v877_v61 }
 0x145   : > { %902 = vst.msk [vmem:[%s1773_s8 + $0x68] sm:$0xff] %vm888_vm1, %v885_v2 }
 0x146   : > { %1426 = shalt.err (!%p1423_p6)
}
 0x147   : > { %s1427_s6 = scalar_lea.hbm %s1820_s27, 2048  ;;  %s1431_s10 = scalar_lea.hbm %s1887_s3, 8192 }
 0x148   : > { %p1428_p7 = scmp.ne.s32.totalorder %s1820_s27, %s1427_s6  ;;  %p1432_p11 = scmp.lt.s32.totalorder %s1820_s27, %s1887_s3 }
 0x149   : > { %p1433_p12 = scmp.lt.s32.totalorder %s1431_s10, %s1427_s6 }
 0x14a   : > { %p1429_p9 = pnand %p1428_p7, %p1581_p3 }
 0x14b   : > { %p1434_p13 = por %p1433_p12, %p1432_p11 }
 0x14c   : > { %p1430_p10 = pneg %p1429_p9 }
 0x14e   : > { %p1435_p0 = pnand %p1434_p13, %p1430_p10 }
 0x150   : > { %1438 = shalt.err (!%p1435_p0)
}
 0x151   : > { %s1508_s16 = smov 128   ;;  %s1509_s24 = smov 8  }
 0x152   : > { %1248 = dma.vmem_to_hbm [thread:$0]  (%p1581_p3), %s1822_s21, 2048, %s1820_s27, %s1833_s28, %s1508_s16, %s1508_s16, %s1509_s24  }
 0x153 PF: > { %p1254_p1 = scmp.ge.s32.totalorder %s1505_s19, 2  ;;  %s937_s9 = sand.u32 1, %s1477_s12  }
 0x154   : > { %s938_s29 = scalar_lea.sflag [#allocation3], %s937_s9 }
 0x155   : > { %p1251_p2 = pnand %p1254_p1, %p1590_p8 }
 0x157   : > { %p1252_p4 = pneg %p1251_p2 }
 0x159   : > { %1472 = dma.done.wait (%p1252_p4), %s938_s29, 2048  }
 0x15a   : > { %1474 = vsyncadd (%p1252_p4), %s938_s29, 4294965248  ;;  %s16_s19 = sadd.s32 1, %s1505_s19   ;;  %s1890_s12 = smov %s1481_s13 }
 0x15b   : > { %p13_p5 = scmp.ge.s32.totalorder %s16_s19, 6   ;;  %s1891_s13 = smov %s1485_s14 }
 0x15c   : > { %s1892_s14 = smov %s1599_s30  ;;  %s1893_s15 = smov %s1497_s17 }
 0x15d   : > { %s1894_s16 = smov %s1501_s18  ;;  %s1895_s17 = smov %s1898_s22 }
 0x15e   : > { %s1896_s18 = smov %s1902_s23  ;;  %15 = sbr.rel (!%p13_p5) target bundleno = 5 (0x5), region = 69 }
 0x163   :  { %943 = vsyncpa [#allocation3], 1 }
 0x164   :  { %945 = vsyncpa [#allocation3 + $0x1], 1 }

</bundles_post_ra>
